<compile_context>
chip_gen: v7x
topology: tpu7x:2x2x1
jax: 0.10.0
libtpu: 0.0.40
codegen_flags: <defaults>
</compile_context>

<pallas_src>
import jax
import jax.numpy as jnp
from jax.experimental import pallas as pl
from jax.experimental.pallas import tpu as pltpu


def basic_conv_pallas(x_nchw, weight_oihw, gamma, beta, running_mean,
                      running_var, *, stride=1, padding=1, dilation=1,
                      groups=1, eps=1e-5):
    """BasicConv forward.  x_nchw: (N, Cin, H, W) f32 -> (N, Cout, Ho, Wo) f32."""
    assert stride == 1 and dilation == 1 and groups == 1, (
        "TODO(synk): only stride=1, dilation=1, groups=1 is implemented")

    N, Cin, H, W = x_nchw.shape
    Cout, w_cin, KH, KW = weight_oihw.shape
    assert w_cin == Cin

    Hp, Wp = H + 2 * padding, W + 2 * padding
    Ho, Wo = Hp - (KH - 1), Wp - (KW - 1)
    K = KH * KW * Cin

    # ---------------- cheap wrapper-side prep (tiny, single XLA pass) ------
    # NHWC + spatial zero pad; kept f32 (halo slicing in-kernel stays f32,
    # the bf16 cast happens once on the patch matrix right before the MXU).
    x_nhwc = jnp.transpose(x_nchw, (0, 2, 3, 1)).astype(jnp.float32)
    x_pad = jnp.pad(
        x_nhwc, ((0, 0), (padding, padding), (padding, padding), (0, 0)))

    # Fold BN (inference / running-stats form) into per-channel scale+shift,
    # then fold the scale directly into the conv weight.
    inv_std = 1.0 / jnp.sqrt(running_var + eps)
    scale = gamma * inv_std                                        # (Cout,)
    shift = (beta - running_mean * scale).reshape(1, Cout).astype(jnp.float32)

    # OIHW -> (KH, KW, Cin, Cout) -> (K, Cout); K index = (kh*KW + kw)*Cin + cin,
    # matching the in-kernel tap concatenation order below.
    w_mat = jnp.transpose(weight_oihw, (2, 3, 1, 0)).reshape(K, Cout)
    w_fold = (w_mat * scale[None, :]).astype(jnp.bfloat16)         # (K, Cout)

    def kernel(x_ref, w_ref, shift_ref, o_ref):
        # x_ref:     (1, Hp, Wp, Cin)  f32   one padded NHWC image
        # w_ref:     (K, Cout)         bf16  BN-scale-folded weights (fetched once)
        # shift_ref: (1, Cout)         f32   folded BN shift (fetched once)
        # o_ref:     (1, Ho, Wo, Cout) f32   compact NHWC output tile
        x = x_ref[0]                                               # (Hp, Wp, Cin)
        # In-VMEM im2col: KH*KW static halo slices -> (Ho*Wo, K) patch matrix.
        taps = [x[kh:kh + Ho, kw:kw + Wo, :].reshape(Ho * Wo, Cin)
                for kh in range(KH) for kw in range(KW)]
        patches = jnp.concatenate(taps, axis=-1).astype(jnp.bfloat16)
        # One MXU matmul, f32 accumulation, fused BN shift + ReLU epilogue.
        acc = jnp.dot(patches, w_ref[...], preferred_element_type=jnp.float32)
        y = jnp.maximum(acc + shift_ref[...], 0.0)                 # (Ho*Wo, Cout)
        o_ref[...] = y.reshape(1, Ho, Wo, Cout).astype(o_ref.dtype)

    out_nhwc = pl.pallas_call(
        kernel,
        out_shape=jax.ShapeDtypeStruct((N, Ho, Wo, Cout), jnp.float32),
        grid_spec=pltpu.PrefetchScalarGridSpec(
            num_scalar_prefetch=0,
            grid=(N,),   # one image per step; N=2 -> 2 parallel steps (v7x megacore)
            in_specs=[
                pl.BlockSpec((1, Hp, Wp, Cin), lambda n: (n, 0, 0, 0)),
                pl.BlockSpec((K, Cout), lambda n: (0, 0)),      # fetched once
                pl.BlockSpec((1, Cout), lambda n: (0, 0)),      # fetched once
            ],
            out_specs=pl.BlockSpec((1, Ho, Wo, Cout), lambda n: (n, 0, 0, 0)),
        ),
        compiler_params=pltpu.CompilerParams(
            dimension_semantics=("parallel",)),
    )(x_pad, w_fold, shift)

    # Only post-kernel layout op: compact NHWC -> NCHW (drop if the consumer
    # can take NHWC directly).
    return jnp.transpose(out_nhwc, (0, 3, 1, 2))


def _reference(x_nchw, weight_oihw, gamma, beta, running_mean, running_var,
               *, padding=1, eps=1e-5):
    """Pure-JAX f32 reference (lax conv + BN(eval) + ReLU)."""
    y = jax.lax.conv_general_dilated(
        x_nchw, weight_oihw, window_strides=(1, 1),
        padding=((padding, padding), (padding, padding)),
        dimension_numbers=("NCHW", "OIHW", "NCHW"),
        precision=jax.lax.Precision.HIGHEST)
    inv_std = 1.0 / jnp.sqrt(running_var + eps)
    y = (y - running_mean[None, :, None, None]) * inv_std[None, :, None, None]
    y = y * gamma[None, :, None, None] + beta[None, :, None, None]
    return jnp.maximum(y, 0.0)


if __name__ == "__main__":
    # BasicConv(in_planes=4, out_planes=8, kernel_size=3, stride=1, padding=1,
    #           relu=True, bn=True, bias=False)
    N, Cin, H, W = 2, 4, 16, 16
    Cout, KH, KW = 8, 3, 3
    eps = 1e-5

    key = jax.random.PRNGKey(0)
    kx, kw, kg, kb, km, kv = jax.random.split(key, 6)

    x = jax.random.normal(kx, (N, Cin, H, W), dtype=jnp.float32)
    weight = jax.random.normal(kw, (Cout, Cin, KH, KW), dtype=jnp.float32) * 0.1
    gamma = 1.0 + 0.1 * jax.random.normal(kg, (Cout,), dtype=jnp.float32)
    beta = 0.1 * jax.random.normal(kb, (Cout,), dtype=jnp.float32)
    running_mean = 0.1 * jax.random.normal(km, (Cout,), dtype=jnp.float32)
    running_var = jnp.abs(
        1.0 + 0.1 * jax.random.normal(kv, (Cout,), dtype=jnp.float32))

    out = basic_conv_pallas(x, weight, gamma, beta, running_mean, running_var)
    out = jax.block_until_ready(out)
    assert out.shape == (N, Cout, H, W)

    # Tight check: reference built with the exact same bf16 operand
    # quantization (x -> bf16, BN-scale-folded weight -> bf16, f32 accum).
    inv_std = 1.0 / jnp.sqrt(running_var + eps)
    scale = gamma * inv_std
    shift = beta - running_mean * scale
    x_q = x.astype(jnp.bfloat16).astype(jnp.float32)
    w_fold_q = (weight * scale[:, None, None, None]
                ).astype(jnp.bfloat16).astype(jnp.float32)
    y_q = jax.lax.conv_general_dilated(
        x_q, w_fold_q, window_strides=(1, 1), padding=((1, 1), (1, 1)),
        dimension_numbers=("NCHW", "OIHW", "NCHW"),
        precision=jax.lax.Precision.HIGHEST)
    ref_tight = jnp.maximum(y_q + shift[None, :, None, None], 0.0)
    assert jnp.allclose(out, ref_tight, atol=2e-3, rtol=2e-3), \
        "mismatch vs bf16-quantized reference"

    # Loose semantic check vs. the full-f32 BasicConv forward.
    ref = _reference(x, weight, gamma, beta, running_mean, running_var)
    assert jnp.allclose(out, ref, atol=5e-2, rtol=5e-2), \
        "mismatch vs f32 reference"

    print("KERNEL_OK")
</pallas_src>

<mosaic_0001>
module attributes {stable_mosaic.version = 11 : i64} {
  func.func @kernel(%arg0: i32, %arg1: memref<1x18x18x4xf32, #tpu.memory_space<vmem>>, %arg2: memref<36x8xbf16, #tpu.memory_space<vmem>>, %arg3: memref<1x8xf32, #tpu.memory_space<vmem>>, %arg4: memref<1x16x16x8xf32, #tpu.memory_space<vmem>>) attributes {dimension_semantics = [#tpu.dimension_semantics<parallel>], iteration_bounds = array<i64: 2>, scalar_prefetch = 0 : i64, scratch_operands = 0 : i64, tpu.core_type = #tpu.core_type<tc>, window_params = [{transform_indices = @transform_0, window_bounds = array<i64: 1, 18, 18, 4>}, {pipeline_mode = #tpu.pipeline_mode<synchronous>, transform_indices = @transform_1, window_bounds = array<i64: 36, 8>}, {pipeline_mode = #tpu.pipeline_mode<synchronous>, transform_indices = @transform_2, window_bounds = array<i64: 1, 8>}, {transform_indices = @transform_3, window_bounds = array<i64: 1, 16, 16, 8>}]} {
    %c0 = arith.constant 0 : index
    %c0_0 = arith.constant 0 : index
    %c0_1 = arith.constant 0 : index
    %c0_2 = arith.constant 0 : index
    %0 = vector.load %arg1[%c0, %c0_0, %c0_1, %c0_2] : memref<1x18x18x4xf32, #tpu.memory_space<vmem>>, vector<1x18x18x4xf32>
    %1 = vector.shape_cast %0 : vector<1x18x18x4xf32> to vector<18x18x4xf32>
    %2 = vector.extract_strided_slice %1 {offsets = [0, 0, 0], sizes = [16, 16, 4], strides = [1, 1, 1]} : vector<18x18x4xf32> to vector<16x16x4xf32>
    %3 = vector.shape_cast %2 : vector<16x16x4xf32> to vector<256x4xf32>
    %4 = vector.extract_strided_slice %1 {offsets = [0, 1, 0], sizes = [16, 16, 4], strides = [1, 1, 1]} : vector<18x18x4xf32> to vector<16x16x4xf32>
    %5 = vector.shape_cast %4 : vector<16x16x4xf32> to vector<256x4xf32>
    %6 = vector.extract_strided_slice %1 {offsets = [0, 2, 0], sizes = [16, 16, 4], strides = [1, 1, 1]} : vector<18x18x4xf32> to vector<16x16x4xf32>
    %7 = vector.shape_cast %6 : vector<16x16x4xf32> to vector<256x4xf32>
    %8 = vector.extract_strided_slice %1 {offsets = [1, 0, 0], sizes = [16, 16, 4], strides = [1, 1, 1]} : vector<18x18x4xf32> to vector<16x16x4xf32>
    %9 = vector.shape_cast %8 : vector<16x16x4xf32> to vector<256x4xf32>
    %10 = vector.extract_strided_slice %1 {offsets = [1, 1, 0], sizes = [16, 16, 4], strides = [1, 1, 1]} : vector<18x18x4xf32> to vector<16x16x4xf32>
    %11 = vector.shape_cast %10 : vector<16x16x4xf32> to vector<256x4xf32>
    %12 = vector.extract_strided_slice %1 {offsets = [1, 2, 0], sizes = [16, 16, 4], strides = [1, 1, 1]} : vector<18x18x4xf32> to vector<16x16x4xf32>
    %13 = vector.shape_cast %12 : vector<16x16x4xf32> to vector<256x4xf32>
    %14 = vector.extract_strided_slice %1 {offsets = [2, 0, 0], sizes = [16, 16, 4], strides = [1, 1, 1]} : vector<18x18x4xf32> to vector<16x16x4xf32>
    %15 = vector.shape_cast %14 : vector<16x16x4xf32> to vector<256x4xf32>
    %16 = vector.extract_strided_slice %1 {offsets = [2, 1, 0], sizes = [16, 16, 4], strides = [1, 1, 1]} : vector<18x18x4xf32> to vector<16x16x4xf32>
    %17 = vector.shape_cast %16 : vector<16x16x4xf32> to vector<256x4xf32>
    %18 = vector.extract_strided_slice %1 {offsets = [2, 2, 0], sizes = [16, 16, 4], strides = [1, 1, 1]} : vector<18x18x4xf32> to vector<16x16x4xf32>
    %19 = vector.shape_cast %18 : vector<16x16x4xf32> to vector<256x4xf32>
    %20 = tpu.concatenate %3, %5, %7, %9, %11, %13, %15, %17, %19 in 1 : vector<256x4xf32>, vector<256x4xf32>, vector<256x4xf32>, vector<256x4xf32>, vector<256x4xf32>, vector<256x4xf32>, vector<256x4xf32>, vector<256x4xf32>, vector<256x4xf32> -> vector<256x36xf32>
    %21 = arith.truncf %20 : vector<256x36xf32> to vector<256x36xbf16>
    %c0_3 = arith.constant 0 : index
    %c0_4 = arith.constant 0 : index
    %22 = vector.load %arg2[%c0_3, %c0_4] : memref<36x8xbf16, #tpu.memory_space<vmem>>, vector<36x8xbf16>
    %cst = arith.constant dense<0.000000e+00> : vector<256x8xf32>
    %23 = tpu.matmul %21, %22, %cst {dimension_numbers = #tpu.dot_dimension_numbers<[1], [0], [0], [1], [0, 0, 1, 1], [], []>} : vector<256x36xbf16>, vector<36x8xbf16>, vector<256x8xf32> -> vector<256x8xf32>
    %c0_5 = arith.constant 0 : index
    %c0_6 = arith.constant 0 : index
    %24 = vector.load %arg3[%c0_5, %c0_6] : memref<1x8xf32, #tpu.memory_space<vmem>>, vector<1x8xf32>
    %25 = vector.broadcast %24 : vector<1x8xf32> to vector<256x8xf32>
    %26 = arith.addf %23, %25 : vector<256x8xf32>
    %cst_7 = arith.constant 0.000000e+00 : f32
    %27 = vector.broadcast %cst_7 : f32 to vector<256x8xf32>
    %28 = arith.maximumf %26, %27 : vector<256x8xf32>
    %29 = vector.shape_cast %28 : vector<256x8xf32> to vector<1x16x16x8xf32>
    %c0_8 = arith.constant 0 : index
    %c0_9 = arith.constant 0 : index
    %c0_10 = arith.constant 0 : index
    %c0_11 = arith.constant 0 : index
    %30 = vector.load %arg4[%c0_8, %c0_9, %c0_10, %c0_11] : memref<1x16x16x8xf32, #tpu.memory_space<vmem>>, vector<1x16x16x8xf32>
    tpu.vector_store %arg4[%c0_8, %c0_9, %c0_10, %c0_11], %29 {strides = array<i32>} : memref<1x16x16x8xf32, #tpu.memory_space<vmem>>, vector<1x16x16x8xf32>,
    return
  }
  func.func @transform_0(%arg0: i32) -> (i32, i32, i32, i32) {
    %c0_i32 = arith.constant 0 : i32
    %c0_i32_0 = arith.constant 0 : i32
    %c0_i32_1 = arith.constant 0 : i32
    %c0_i32_2 = arith.constant 0 : i32
    return %arg0, %c0_i32, %c0_i32_0, %c0_i32_1 : i32, i32, i32, i32
  }
  func.func @transform_1(%arg0: i32) -> (i32, i32) {
    %c0_i32 = arith.constant 0 : i32
    %c0_i32_0 = arith.constant 0 : i32
    %c0_i32_1 = arith.constant 0 : i32
    return %c0_i32, %c0_i32_0 : i32, i32
  }
  func.func @transform_2(%arg0: i32) -> (i32, i32) {
    %c0_i32 = arith.constant 0 : i32
    %c0_i32_0 = arith.constant 0 : i32
    %c0_i32_1 = arith.constant 0 : i32
    return %c0_i32, %c0_i32_0 : i32, i32
  }
  func.func @transform_3(%arg0: i32) -> (i32, i32, i32, i32) {
    %c0_i32 = arith.constant 0 : i32
    %c0_i32_0 = arith.constant 0 : i32
    %c0_i32_1 = arith.constant 0 : i32
    %c0_i32_2 = arith.constant 0 : i32
    return %arg0, %c0_i32, %c0_i32_0, %c0_i32_1 : i32, i32, i32, i32
  }
}

</mosaic_0001>

<bundles_post_ra>
// kernel: tpu_custom_call.1
= control target key start
LH: loop header
LB: loop body
LE: loop exit
PB: predicated region body
PF: predicated region fallthrough
CT: control target
= control target key end

     0   :  { %s2680_s12 = smov 0   ;;  %s4150_s0 = inlined_call_operand.vmem [shape: f32[2,18,18,4], index: 0, kind: input, shape index: {}]   ;;  %s4151_s1 = inlined_call_operand.vmem [shape: bf16[36,8], index: 1, kind: input, shape index: {}]   ;;  %s4152_s2 = inlined_call_operand.vmem [shape: f32[1,8], index: 2, kind: input, shape index: {}]   ;;  %s4153_s3 = inlined_call_operand.vmem [shape: f32[2,16,16,8], index: 3, kind: output, shape index: {}]  }
   0x1 LB: > { %s1870_s13 = sadd.s32 4294967295, %s2650_s12   ;;  %p1874_p0 = scmp.ge.s32.totalorder %s2650_s12, 1  ;;  %s2650_s12 = sphi %s2680_s12, %s13_s12  }
   0x2   : > { %p137_p1 = scmp.lt.s32.totalorder %s2650_s12, 3 }
   0x4   : > { %p138_p2 = pnand %p1874_p0, %p137_p1 }
   0x6   : > { %141 = sbr.rel (%p138_p2) target bundleno = 619 (0x26b), region = 32 }
   0xd   : > { %p161_p3 = scmp.lt.s32.totalorder %s1870_s13, 1  ;;  %vm274_vm0 = vcmask 1046528   ;;  %s2652_s18 = smov 4   ;;  %vm355_vm1 = vcmask 1045504   ;;  %vm1586_vm2 = vcmask 1041408   ;;  %vm1230_vm3 = vcmask 31744  }
   0xe   : > { %s2653_s19 = smov 8   ;;  %s2654_s20 = smov 12   ;;  %vm1263_vm4 = vcmask 64512   ;;  %vm1296_vm5 = vcmask 97280   ;;  %vm1329_vm6 = vcmask 130048   ;;  %vm1362_vm7 = vcmask 162816  }
   0xf   : > { %s4270_s13 = smov (!%p161_p3, %s1870_s13), 1  ;;  %s2655_s21 = smov 16   ;;  %vm1395_vm8 = vcmask 195584   ;;  %vm1428_vm9 = vcmask 228352   ;;  %vm1461_vm10 = vcmask 261120   ;;  %vm1537_vm11 = vcmask 293888  }
  0x10   : > { %s1966_s14 = smul.u32 432, %s4270_s13  ;;  %s2656_s22 = smov 20  }
  0x11   : > { %s2657_s23 = smov 24   ;;  %s2658_s28 = smov 28  }
  0x12   : > { %s2694_s17 = scalar_lea.vmem %s4150_s0, %s1966_s14  ;;  %s2659_s4 = smov 32  }
  0x13   : > { %v2697_v0 = vld [vmem:[%s2694_s17 + $0x30] sm:$0xff]  ;;  %v2700_v1 = vld [vmem:[%s2694_s17 + $0x38] sm:$0xff]  ;;  %v2703_v2 = vld [vmem:[%s2694_s17 + $0x40] sm:$0x3]  ;;  %s1900_s7 = sshll.u32 %s4270_s13, 8 }
  0x14   : > { %v285_v3 = vrot.slane %v2697_v0, 1  ;;  %v286_v4 = vrot.slane %v2700_v1, 1  ;;  %v288_v5 = vrot.slane %v2703_v2, 1  ;;  %v2709_v6 = vld [vmem:[%s2694_s17] sm:$0xff]  ;;  %v2712_v7 = vld [vmem:[%s2694_s17 + $0x8] sm:$0xff]  ;;  %v2723_v12 = vld [vmem:[%s2694_s17 + $0x50] sm:$0xff]  ;;  %s4050_s10 = scalar_lea.vmem %s4153_s3, %s1900_s7 }
  0x15   : > { %v2715_v8 = vld [vmem:[%s2694_s17 + $0x10] sm:$0x3]  ;;  %v275_v9 = vrot.slane %v2709_v6, 1  ;;  %v276_v10 = vrot.slane %v2712_v7, 1  ;;  %v2720_v11 = vld [vmem:[%s2694_s17 + $0x48] sm:$0xff]  ;;  %v2732_v17 = vld [vmem:[%s2694_s17 + $0x18] sm:$0xff] }
  0x16   : > { %v287_v13 = vsel %vm274_vm0, %v285_v3, %v286_v4  ;;  %v289_v14 = vsel %vm274_vm0, %v286_v4, %v288_v5  ;;  %v278_v15 = vrot.slane %v2715_v8, 1  ;;  %v2729_v16 = vld [vmem:[%s2694_s17 + $0x58] sm:$0x3]  ;;  %v2735_v18 = vld [vmem:[%s2694_s17 + $0x20] sm:$0xff]  ;;  %v290_v21 = vrot.slane %v2720_v11, 1  ;;  %v2767_v36 = vld [vmem:[%s2694_s17 + $0x68] sm:$0xff] }
  0x17   : > { %v2737_v19 = vpack.i.bf16 %v289_v14, %v287_v13  ;;  %v277_v20 = vsel %vm274_vm0, %v275_v9, %v276_v10  ;;  %v291_v22 = vrot.slane %v2723_v12, 1  ;;  %v2743_v23 = vld [vmem:[%s2694_s17 + $0x28] sm:$0x3]  ;;  %v2746_v24 = vld [vmem:[%s2694_s17 + $0x78] sm:$0xff]  ;;  %v2749_v25 = vld [vmem:[%s2694_s17 + $0x80] sm:$0xff]  ;;  %v293_v27 = vrot.slane %v2729_v16, 1 }
  0x18   : > { %v279_v26 = vsel %vm274_vm0, %v276_v10, %v278_v15  ;;  %v280_v28 = vrot.slane %v2732_v17, 1  ;;  %v281_v29 = vrot.slane %v2735_v18, 1  ;;  %v2756_v30 = vld [vmem:[%s2694_s17 + $0x88] sm:$0x3]  ;;  %v2759_v31 = vld [vmem:[%s2694_s17 + $0x60] sm:$0xff]  ;;  %v283_v34 = vrot.slane %v2743_v23, 1 }
  0x19   : > { %4195 = vst [vmem:[#allocation2_spill] sm:$0xff] %v2737_v19  ;;  %1994 = vrot.lane.b32.xlu1 %v2737_v19, %s2652_s18  ;;  %v1983_v32 = vpack.i.bf16 %v279_v26, %v277_v20  ;;  %v292_v33 = vsel %vm274_vm0, %v290_v21, %v291_v22  ;;  %v300_v35 = vrot.slane %v2746_v24, 1  ;;  %v2770_v37 = vld [vmem:[%s2694_s17 + $0x70] sm:$0x3]  ;;  %v294_v38 = vsel %vm274_vm0, %v291_v22, %v293_v27  ;;  %v2777_v42 = vld [vmem:[%s2694_s17 + $0xa8] sm:$0xff]  ;;  %v2795_v50 = vld [vmem:[%s2694_s17 + $0x98] sm:$0xff] }
  0x1a   : > { %v282_v39 = vsel %vm274_vm0, %v280_v28, %v281_v29  ;;  %v301_v40 = vrot.slane %v2749_v25, 1  ;;  %v303_v41 = vrot.slane %v2756_v30, 1  ;;  %v2780_v43 = vld [vmem:[%s2694_s17 + $0xb0] sm:$0xff]  ;;  %v2783_v44 = vpack.i.bf16 %v294_v38, %v292_v33  ;;  %v2789_v48 = vld [vmem:[%s2694_s17 + $0xb8] sm:$0x3]  ;;  %v2816_v61 = vld [vmem:[%s2694_s17 + $0xe0] sm:$0xff] }
  0x1b   : > { %1984 = vrot.lane.b32.xlu0 %v1983_v32, %s2652_s18  ;;  %v284_v45 = vsel %vm274_vm0, %v281_v29, %v283_v34  ;;  %v295_v46 = vrot.slane %v2759_v31, 1  ;;  %v296_v47 = vrot.slane %v2767_v36, 1  ;;  %v2792_v49 = vld [vmem:[%s2694_s17 + $0x90] sm:$0xff]  ;;  %v298_v54 = vrot.slane %v2770_v37, 1  ;;  %v2803_v55 = vld [vmem:[%s2694_s17 + $0xa0] sm:$0x3] }
  0x1c   : > { %4196 = vst [vmem:[#allocation3_spill] sm:$0xff] %v2783_v44  ;;  %v2797_v51 = vpack.i.bf16 %v284_v45, %v282_v39  ;;  %v302_v52 = vsel %vm274_vm0, %v300_v35, %v301_v40  ;;  %v304_v53 = vsel %vm274_vm0, %v301_v40, %v303_v41  ;;  %v2806_v56 = vld [vmem:[%s2694_s17 + $0xd8] sm:$0xff]  ;;  %v310_v59 = vrot.slane %v2777_v42, 1  ;;  %v2819_v62 = vld [vmem:[%s2694_s17 + $0xe8] sm:$0x3]  ;;  %v2826_v9 = vld [vmem:[%s2694_s17 + $0xc0] sm:$0xff] }
  0x1d   : > { %1999 = vrot.lane.b32.xlu1 %v2783_v44, %s2652_s18  ;;  %v2810_v57 = vpack.i.bf16 %v304_v53, %v302_v52  ;;  %v297_v58 = vsel %vm274_vm0, %v295_v46, %v296_v47  ;;  %v311_v60 = vrot.slane %v2780_v43, 1  ;;  %v299_v63 = vsel %vm274_vm0, %v296_v47, %v298_v54  ;;  %v2829_v10 = vld [vmem:[%s2694_s17 + $0xc8] sm:$0xff]  ;;  %v2839_v21 = vld [vmem:[%s2694_s17 + $0xd0] sm:$0x3]  ;;  %v2859_v39 = vld [vmem:[%s2694_s17 + $0x118] sm:$0x3] }
  0x1e   : > { %4197 = vst [vmem:[#allocation4_spill] sm:$0xff] %v2797_v51  ;;  %v313_v3 = vrot.slane %v2789_v48, 1  ;;  %v305_v4 = vrot.slane %v2792_v49, 1  ;;  %v306_v5 = vrot.slane %v2795_v50, 1  ;;  %v2833_v13 = vpack.i.bf16 %v299_v63, %v297_v58  ;;  %v2846_v29 = vld [vmem:[%s2694_s17 + $0x108] sm:$0xff]  ;;  %v2849_v32 = vld [vmem:[%s2694_s17 + $0x110] sm:$0xff] }
  0x1f   : > { %4198 = vst [vmem:[#allocation5_spill] sm:$0xff] %v2810_v57  ;;  %1989 = vrot.lane.b32.xlu0 %v2797_v51, %s2652_s18  ;;  %v312_v14 = vsel %vm274_vm0, %v310_v59, %v311_v60  ;;  %v308_v15 = vrot.slane %v2803_v55, 1  ;;  %v320_v20 = vrot.slane %v2806_v56, 1  ;;  %v321_v27 = vrot.slane %v2816_v61, 1  ;;  %v2862_v40 = vld [vmem:[%s2694_s17 + $0xf0] sm:$0xff]  ;;  %v2865_v41 = vld [vmem:[%s2694_s17 + $0xf8] sm:$0xff] }
  0x20   : > { %4199 = vst [vmem:[#allocation6_spill] sm:$0xff] %v2833_v13  ;;  %v314_v22 = vsel %vm274_vm0, %v311_v60, %v313_v3  ;;  %v307_v26 = vsel %vm274_vm0, %v305_v4, %v306_v5  ;;  %v323_v28 = vrot.slane %v2819_v62, 1  ;;  %v315_v35 = vrot.slane %v2826_v9, 1  ;;  %v2871_v52 = vld [vmem:[%s2694_s17 + $0x100] sm:$0x3]  ;;  %v2881_v60 = vld [vmem:[%s2694_s17 + $0x138] sm:$0xff] }
  0x21   : > { %2009 = vrot.lane.b32.xlu1 %v2810_v57, %s2652_s18  ;;  %v2853_v33 = vpack.i.bf16 %v314_v22, %v312_v14  ;;  %v309_v34 = vsel %vm274_vm0, %v306_v5, %v308_v15  ;;  %v316_v38 = vrot.slane %v2829_v10, 1  ;;  %v322_v45 = vsel %vm274_vm0, %v320_v20, %v321_v27  ;;  %v2884_v63 = vld [vmem:[%s2694_s17 + $0x140] sm:$0xff]  ;;  %v2887_v3 = vld [vmem:[%s2694_s17 + $0x148] sm:$0x3] }
  0x22   : > { %v324_v46 = vsel %vm274_vm0, %v321_v27, %v323_v28  ;;  %v318_v47 = vrot.slane %v2839_v21, 1  ;;  %v2875_v53 = vpack.i.bf16 %v309_v34, %v307_v26  ;;  %v330_v58 = vrot.slane %v2846_v29, 1  ;;  %v2894_v20 = vld [vmem:[%s2694_s17 + $0x120] sm:$0xff]  ;;  %v2897_v22 = vld [vmem:[%s2694_s17 + $0x128] sm:$0xff]  ;;  %v2906_v34 = vld [vmem:[%s2694_s17 + $0x130] sm:$0x3] }
  0x23   : > { %4200 = vst [vmem:[#allocation7_spill] sm:$0xff] %v2853_v33  ;;  %2004 = vrot.lane.b32.xlu0 %v2833_v13, %s2652_s18  ;;  %v317_v54 = vsel %vm274_vm0, %v315_v35, %v316_v38  ;;  %v331_v59 = vrot.slane %v2849_v32, 1  ;;  %v333_v5 = vrot.slane %v2859_v39, 1  ;;  %v325_v14 = vrot.slane %v2862_v40, 1  ;;  %4202 = vst [vmem:[#allocation9_spill] sm:$0xff] %v2894_v20  ;;  %v2913_v13 = vld [vmem:[%s2694_s17 + $0x168] sm:$0xff] }
  0x24   : > { %4201 = vst [vmem:[#allocation8_spill] sm:$0xff] %v2875_v53  ;;  %v319_v4 = vsel %vm274_vm0, %v316_v38, %v318_v47  ;;  %v326_v15 = vrot.slane %v2865_v41, 1  ;;  %4203 = vst [vmem:[#allocation10_spill] sm:$0xff] %v2897_v22  ;;  %v2901_v26 = vpack.i.bf16 %v324_v46, %v322_v45  ;;  %v328_v28 = vrot.slane %v2871_v52, 1  ;;  %v2916_v45 = vld [vmem:[%s2694_s17 + $0x170] sm:$0xff] }
  0x25   : > { %2019 = vrot.lane.b32.xlu1 %v2853_v33, %s2652_s18  ;;  %v332_v27 = vsel %vm274_vm0, %v330_v58, %v331_v59  ;;  %4205 = vst [vmem:[#allocation12_spill] sm:$0xff] %v2906_v34  ;;  %v334_v35 = vsel %vm274_vm0, %v331_v59, %v333_v5  ;;  %v340_v38 = vrot.slane %v2881_v60, 1  ;;  %v341_v47 = vrot.slane %v2884_v63, 1  ;;  %4206 = vst [vmem:[#allocation13_spill] sm:$0xff] %v2913_v13  ;;  %v2925_v5 = vld [vmem:[%s2694_s17 + $0x178] sm:$0x3] }
  0x26   : > { %4204 = vst [vmem:[#allocation11_spill] sm:$0xff] %v2901_v26  ;;  %v343_v57 = vrot.slane %v2887_v3, 1  ;;  %4207 = vst [vmem:[#allocation14_spill] sm:$0xff] %v2916_v45  ;;  %v2920_v46 = vpack.i.bf16 %v319_v4, %v317_v54  ;;  %v335_v58 = vrot.slane %v2894_v20, 1  ;;  %v336_v59 = vrot.slane %v2897_v22, 1  ;;  %v2940_v22 = vld [vmem:[%s2694_s17 + $0x158] sm:$0xff] }
  0x27   : > { %2014 = vrot.lane.b32.xlu0 %v2875_v53, %s2652_s18  ;;  %v327_v33 = vsel %vm274_vm0, %v325_v14, %v326_v15  ;;  %v329_v44 = vsel %vm274_vm0, %v326_v15, %v328_v28  ;;  %v338_v51 = vrot.slane %v2906_v34, 1  ;;  %v2932_v19 = vpack.i.bf16 %v334_v35, %v332_v27  ;;  %v2937_v53 = vld [vmem:[%s2694_s17 + $0x150] sm:$0xff]  ;;  %v2943_v20 = vld [vmem:[%s2694_s17 + $0x160] sm:$0x3] }
  0x28   : > { %4208 = vst [vmem:[#allocation15_spill] sm:$0xff] %v2920_v46  ;;  %v350_v54 = vrot.slane %v2913_v13, 1  ;;  %v351_v4 = vrot.slane %v2916_v45, 1  ;;  %v342_v14 = vsel %vm274_vm0, %v340_v38, %v341_v47  ;;  %v344_v15 = vsel %vm274_vm0, %v341_v47, %v343_v57 }
  0x29   : > { %2029 = vrot.lane.b32.xlu1 %v2901_v26, %s2652_s18  ;;  %v353_v28 = vrot.slane %v2925_v5, 1  ;;  %v2950_v27 = vpack.i.bf16 %v329_v44, %v327_v33  ;;  %v337_v35 = vsel %vm274_vm0, %v335_v58, %v336_v59  ;;  %v339_v26 = vsel %vm274_vm0, %v336_v59, %v338_v51 }
  0x2a   : > { %v345_v45 = vrot.slane %v2937_v53, 1  ;;  %v346_v13 = vrot.slane %v2940_v22, 1  ;;  %v348_v34 = vrot.slane %v2943_v20, 1  ;;  %v2959_v57 = vpack.i.bf16 %v344_v15, %v342_v14 }
  0x2b   : > { %2024 = vrot.lane.b32.xlu0 %v2920_v46, %s2652_s18  ;;  %v352_v38 = vsel %vm274_vm0, %v350_v54, %v351_v4  ;;  %v354_v44 = vsel %vm274_vm0, %v351_v4, %v353_v28  ;;  %v361_v33 = vrot.slane %v2732_v17, 2  ;;  %v362_v47 = vrot.slane %v2735_v18, 2 }
  0x2c   : > { %v364_v51 = vrot.slane %v2743_v23, 2  ;;  %v2968_v58 = vpack.i.bf16 %v339_v26, %v337_v35  ;;  %v356_v59 = vrot.slane %v2709_v6, 2  ;;  %v357_v14 = vrot.slane %v2712_v7, 2 }
  0x2d   : > { %2039 = vrot.lane.b32.xlu1 %v2932_v19, %s2652_s18  ;;  %v359_v54 = vrot.slane %v2715_v8, 2  ;;  %v347_v4 = vsel %vm274_vm0, %v345_v45, %v346_v13  ;;  %v349_v15 = vsel %vm274_vm0, %v346_v13, %v348_v34  ;;  %v2977_v23 = vpack.i.bf16 %v354_v44, %v352_v38 }
  0x2e   : > { %v371_v28 = vrot.slane %v2720_v11, 2  ;;  %v372_v26 = vrot.slane %v2723_v12, 2  ;;  %v374_v35 = vrot.slane %v2729_v16, 2  ;;  %v369_v6 = vrot.slane %v2703_v2, 2 }
  0x2f   : > { %2034 = vrot.lane.b32.xlu0 %v2950_v27, %s2652_s18  ;;  %4209 = vst [vmem:[#allocation16_spill] sm:$0xff] %v2977_v23  ;;  %v363_v7 = vsel %vm355_vm1, %v361_v33, %v362_v47  ;;  %v365_v8 = vsel %vm355_vm1, %v362_v47, %v364_v51  ;;  %v2987_v13 = vpack.i.bf16 %v349_v15, %v347_v4  ;;  %v366_v45 = vrot.slane %v2697_v0, 2 }
  0x30   : > { %v358_v34 = vsel %vm355_vm1, %v356_v59, %v357_v14  ;;  %v367_v38 = vrot.slane %v2700_v1, 2  ;;  %v360_v44 = vsel %vm355_vm1, %v357_v14, %v359_v54  ;;  %v381_v16 = vrot.slane %v2746_v24, 2 }
  0x31   : > { %2049 = vrot.lane.b32.xlu1 %v2959_v57, %s2652_s18  ;;  %v382_v2 = vrot.slane %v2749_v25, 2  ;;  %v384_v33 = vrot.slane %v2756_v30, 2  ;;  %v2998_v47 = vpack.i.bf16 %v365_v8, %v363_v7  ;;  %v373_v51 = vsel %vm355_vm1, %v371_v28, %v372_v26 }
  0x32   : > { %v375_v59 = vsel %vm355_vm1, %v372_v26, %v374_v35  ;;  %v376_v4 = vrot.slane %v2759_v31, 2  ;;  %v377_v15 = vrot.slane %v2767_v36, 2  ;;  %v379_v14 = vrot.slane %v2770_v37, 2 }
  0x33   : > { %2044 = vrot.lane.b32.xlu0 %v2968_v58, %s2652_s18  ;;  %v2063_v54 = vpack.i.bf16 %v360_v44, %v358_v34  ;;  %v368_v30 = vsel %vm355_vm1, %v366_v45, %v367_v38  ;;  %v370_v46 = vsel %vm355_vm1, %v367_v38, %v369_v6  ;;  %v3009_v7 = vpack.i.bf16 %v375_v59, %v373_v51 }
  0x34   : > { %v383_v28 = vsel %vm355_vm1, %v381_v16, %v382_v2  ;;  %v385_v26 = vsel %vm355_vm1, %v382_v2, %v384_v33  ;;  %v391_v35 = vrot.slane %v2777_v42, 2  ;;  %v392_v37 = vrot.slane %v2780_v43, 2 }
  0x35   : > { %2059 = vrot.lane.b32.xlu1 %v2977_v23, %s2652_s18  ;;  %v394_v8 = vrot.slane %v2789_v48, 2  ;;  %v386_v34 = vrot.slane %v2792_v49, 2  ;;  %v387_v6 = vrot.slane %v2795_v50, 2  ;;  %v378_v45 = vsel %vm355_vm1, %v376_v4, %v377_v15 }
  0x36   : > { %v380_v38 = vsel %vm355_vm1, %v377_v15, %v379_v14  ;;  %v389_v44 = vrot.slane %v2803_v55, 2  ;;  %v3024_v16 = vpack.i.bf16 %v370_v46, %v368_v30  ;;  %v401_v2 = vrot.slane %v2806_v56, 2 }
  0x37   : > { %2054 = vrot.lane.b32.xlu0 %v2987_v13, %s2652_s18  ;;  %v402_v33 = vrot.slane %v2816_v61, 2  ;;  %v404_v48 = vrot.slane %v2819_v62, 2  ;;  %v3029_v51 = vpack.i.bf16 %v385_v26, %v383_v28  ;;  %v3033_v59 = vpack.i.bf16 %v380_v38, %v378_v45 }
  0x38   : > { %v393_v4 = vsel %vm355_vm1, %v391_v35, %v392_v37  ;;  %v395_v55 = vsel %vm355_vm1, %v392_v37, %v394_v8  ;;  %v388_v46 = vsel %vm355_vm1, %v386_v34, %v387_v6  ;;  %v390_v15 = vsel %vm355_vm1, %v387_v6, %v389_v44 }
  0x39   : > { %2069 = vrot.lane.b32.xlu1 %v2998_v47, %s2653_s19  ;;  %v396_v14 = vrot.slane %v2826_v9, 2  ;;  %v399_v62 = vrot.slane %v2839_v21, 2  ;;  %v403_v30 = vsel %vm355_vm1, %v401_v2, %v402_v33  ;;  %v405_v28 = vsel %vm355_vm1, %v402_v33, %v404_v48 }
  0x3a   : > { %v411_v26 = vrot.slane %v2846_v29, 2  ;;  %v412_v35 = vrot.slane %v2849_v32, 2  ;;  %v414_v37 = vrot.slane %v2859_v39, 2  ;;  %v406_v8 = vrot.slane %v2862_v40, 2 }
  0x3b   : > { %2064 = vrot.lane.b32.xlu0 %v2063_v54, %s2653_s19  ;;  %v397_v54 = vrot.slane %v2829_v10, 2  ;;  %v407_v34 = vrot.slane %v2865_v41, 2  ;;  %v409_v6 = vrot.slane %v2871_v52, 2  ;;  %v3054_v21 = vpack.i.bf16 %v395_v55, %v393_v4 }
  0x3c   : > { %v421_v45 = vrot.slane %v2881_v60, 2  ;;  %v422_v38 = vrot.slane %v2884_v63, 2  ;;  %v424_v44 = vrot.slane %v2887_v3, 2  ;;  %v3059_v2 = vpack.i.bf16 %v390_v15, %v388_v46  ;;  %v4212_v3 = vld [vmem:[#allocation9_spill] sm:$0xff] }
  0x3d   : > { %2079 = vrot.lane.b32.xlu1 %v3009_v7, %s2653_s19  ;;  %4210 = vst [vmem:[#allocation17_spill] sm:$0xff] %v3054_v21  ;;  %v3063_v39 = vpack.i.bf16 %v405_v28, %v403_v30  ;;  %v398_v52 = vsel %vm355_vm1, %v396_v14, %v397_v54  ;;  %v400_v33 = vsel %vm355_vm1, %v397_v54, %v399_v62  ;;  %v416_v46 = vrot.slane %v4212_v3, 2  ;;  %v4213_v14 = vld [vmem:[#allocation10_spill] sm:$0xff]  ;;  %v4214_v54 = vld [vmem:[#allocation12_spill] sm:$0xff] }
  0x3e   : > { %v413_v48 = vsel %vm355_vm1, %v411_v26, %v412_v35  ;;  %v415_v4 = vsel %vm355_vm1, %v412_v35, %v414_v37  ;;  %v408_v55 = vsel %vm355_vm1, %v406_v8, %v407_v34  ;;  %v410_v23 = vsel %vm355_vm1, %v407_v34, %v409_v6  ;;  %v4216_v35 = vld [vmem:[#allocation13_spill] sm:$0xff]  ;;  %v4217_v8 = vld [vmem:[#allocation14_spill] sm:$0xff] }
  0x3f   : > { %2074 = vrot.lane.b32.xlu0 %v3024_v16, %s2653_s19  ;;  %4211 = vst [vmem:[#allocation18_spill] sm:$0xff] %v3063_v39  ;;  %v423_v15 = vsel %vm355_vm1, %v421_v45, %v422_v38  ;;  %v425_v30 = vsel %vm355_vm1, %v422_v38, %v424_v44  ;;  %v417_v28 = vrot.slane %v4213_v14, 2  ;;  %v419_v62 = vrot.slane %v4214_v54, 2 }
  0x40   : > { %v3080_v26 = vpack.i.bf16 %v400_v33, %v398_v52  ;;  %v431_v37 = vrot.slane %v4216_v35, 2  ;;  %v432_v34 = vrot.slane %v4217_v8, 2  ;;  %v434_v6 = vrot.slane %v2925_v5, 2 }
  0x41   : > { %2089 = vrot.lane.b32.xlu1 %v3029_v51, %s2653_s19  ;;  %v3087_v45 = vpack.i.bf16 %v410_v23, %v408_v55  ;;  %v3089_v38 = vpack.i.bf16 %v425_v30, %v423_v15  ;;  %v418_v44 = vsel %vm355_vm1, %v416_v46, %v417_v28  ;;  %v420_v52 = vsel %vm355_vm1, %v417_v28, %v419_v62 }
  0x42   : > { %4215 = vst [vmem:[#allocation9_spill] sm:$0xff] %v3080_v26  ;;  %v433_v33 = vsel %vm355_vm1, %v431_v37, %v432_v34  ;;  %v435_v5 = vsel %vm355_vm1, %v432_v34, %v434_v6  ;;  %v427_v23 = vrot.slane %v2940_v22, 2  ;;  %v3106_v55 = vpack.i.bf16 %v420_v52, %v418_v44 }
  0x43   : > { %2084 = vrot.lane.b32.xlu0 %v3033_v59, %s2653_s19  ;;  %v3112_v30 = vpack.i.bf16 %v435_v5, %v433_v33  ;;  %v2148_v28 = vpack.i.bf16 %v2700_v1, %v2697_v0  ;;  %v2143_v54 = vpack.i.bf16 %v2735_v18, %v2732_v17  ;;  %v3129_v62 = vpack.i.bf16 %v2767_v36, %v2759_v31 }
  0x44   : > { %v2153_v37 = vpack.i.bf16 %v2723_v12, %v2720_v11  ;;  %v3138_v0 = vpack.i.bf16 %v2795_v50, %v2792_v49  ;;  %v3143_v1 = vpack.i.bf16 %v2749_v25, %v2746_v24  ;;  %v2178_v11 = vpack.i.bf16 %v2829_v10, %v2826_v9 }
  0x45   : > { %2099 = vrot.lane.b32.xlu1 %v3054_v21, %s2653_s19  ;;  %v3085_v21 = vpack.i.bf16 %v415_v4, %v413_v48  ;;  %v426_v48 = vrot.slane %v2937_v53, 2  ;;  %v429_v4 = vrot.slane %v2943_v20, 2  ;;  %v2173_v12 = vpack.i.bf16 %v2780_v43, %v2777_v42 }
  0x46   : > { %v2188_v17 = vpack.i.bf16 %v2865_v41, %v2862_v40  ;;  %v2183_v18 = vpack.i.bf16 %v2816_v61, %v2806_v56  ;;  %v3162_v9 = vpack.i.bf16 %v4213_v14, %v4212_v3  ;;  %v2193_v10 = vpack.i.bf16 %v2849_v32, %v2846_v29  ;;  %v220_v41 = vld [vmem:[%s2694_s17 + $0x180] sm:$0xff]  ;;  %v221_v56 = vld [vmem:[%s2694_s17 + $0x188] sm:$0xff]  ;;  %v222_v32 = vld [vmem:[%s2694_s17 + $0x190] sm:$0x3] }
  0x47   : > { %2094 = vrot.lane.b32.xlu0 %v3059_v2, %s2653_s19  ;;  %v428_v46 = vsel %vm355_vm1, %v426_v48, %v427_v23  ;;  %v430_v15 = vsel %vm355_vm1, %v427_v23, %v429_v4  ;;  %v3171_v40 = vpack.i.bf16 %v2940_v22, %v2937_v53  ;;  %v3178_v61 = vpack.i.bf16 %v2884_v63, %v2881_v60 }
  0x48   : > { %v3116_v20 = vpack.i.bf16 %v430_v15, %v428_v46  ;;  %v440_v34 = vrot.slane %v221_v56, 1  ;;  %v439_v6 = vrot.slane %v220_v41, 1  ;;  %v3182_v29 = vpack.i.bf16 %v221_v56, %v220_v41  ;;  %v4219_v46 = vld [vmem:[#allocation2_spill] sm:$0xff] }
  0x49   : > { %2109 = vrot.lane.b32.xlu1 %v3063_v39, %s2653_s19  ;;  %v442_v44 = vrot.slane %v222_v32, 1  ;;  %v3189_v52 = vpack.i.bf16 %v4217_v8, %v4216_v35  ;;  %v445_v23 = vrot.slane %v221_v56, 2  ;;  %v444_v4 = vrot.slane %v220_v41, 2  ;;  %v4223_v56 = vld [vmem:[#allocation3_spill] sm:$0xff]  ;;  %v2623_v41 = vld [vmem:[%s4151_s1] sm:$0xff]  }
  0x4a   : > { %4218 = vst [vmem:[#allocation10_spill] sm:$0xff] %v3182_v29  ;;  %v441_v33 = vsel %vm274_vm0, %v439_v6, %v440_v34  ;;  %v447_v15 = vrot.slane %v222_v32, 2  ;;  %1920 = vmatprep.subr.bf16.mxu0 %v2623_v41  ;;  %1958 = vmatprep.subr.bf16.mxu1 %v2623_v41 }
  0x4b   : > { %2104 = vrot.lane.b32.xlu0 %v3080_v26, %s2653_s19  ;;  %v443_v5 = vsel %vm274_vm0, %v440_v34, %v442_v44  ;;  %1921 = vmatpush3.bf16.msra.mxu0 %v2623_v41 }
  0x4c   : > { %v3195_v48 = vpack.i.bf16 %v443_v5, %v441_v33  ;;  %1961 = vmatpush3.bf16.msra.mxu1 %v2623_v41 }
  0x4d   : > { %2119 = vrot.lane.b32.xlu1 %v3085_v21, %s2653_s19 }
  0x4f   : > { %2114 = vrot.lane.b32.xlu0 %v3087_v45, %s2653_s19 }
  0x51   : > { %2129 = vrot.lane.b32.xlu1 %v3089_v38, %s2653_s19 }
  0x53   : > { %2124 = vrot.lane.b32.xlu0 %v3106_v55, %s2653_s19 }
  0x55   : > { %2139 = vrot.lane.b32.xlu1 %v3112_v30, %s2653_s19 }
  0x57   : > { %2134 = vrot.lane.b32.xlu0 %v3116_v20, %s2653_s19 }
  0x59   : > { %2149 = vrot.lane.b32.xlu1 %v2148_v28, %s2654_s20 }
  0x5b   : > { %2144 = vrot.lane.b32.xlu0 %v2143_v54, %s2654_s20  ;;  %v4220_v54 = vld [vmem:[#allocation4_spill] sm:$0xff] }
  0x5d   : > { %2159 = vrot.lane.b32.xlu1 %v3129_v62, %s2654_s20 }
  0x5f   : > { %2154 = vrot.lane.b32.xlu0 %v2153_v37, %s2654_s20 }
  0x61   : > { %2169 = vrot.lane.b32.xlu1 %v3138_v0, %s2654_s20 }
  0x63   : > { %2164 = vrot.lane.b32.xlu0 %v3143_v1, %s2654_s20 }
  0x65   : > { %2179 = vrot.lane.b32.xlu1 %v2178_v11, %s2654_s20  ;;  %v446_v11 = vsel %vm355_vm1, %v444_v4, %v445_v23 }
  0x67   : > { %2174 = vrot.lane.b32.xlu0 %v2173_v12, %s2654_s20  ;;  %v448_v12 = vsel %vm355_vm1, %v445_v23, %v447_v15 }
  0x68   : > { %v3207_v34 = vpack.i.bf16 %v448_v12, %v446_v11  ;;  %v4227_v11 = vld [vmem:[#allocation6_spill] sm:$0xff] }
  0x69   : > { %2189 = vrot.lane.b32.xlu1 %v2188_v17, %s2654_s20 }
  0x6a   : > { %4222 = vst [vmem:[#allocation12_spill] sm:$0xff] %v3207_v34 }
  0x6b   : > { %2184 = vrot.lane.b32.xlu0 %v2183_v18, %s2654_s20  ;;  %v4221_v18 = vld [vmem:[#allocation11_spill] sm:$0xff] }
  0x6d   : > { %2199 = vrot.lane.b32.xlu1 %v3162_v9, %s2654_s20 }
  0x6f   : > { %2194 = vrot.lane.b32.xlu0 %v2193_v10, %s2654_s20 }
  0x71   : > { %2209 = vrot.lane.b32.xlu1 %v3171_v40, %s2654_s20 }
  0x73   : > { %2204 = vrot.lane.b32.xlu0 %v3178_v61, %s2654_s20 }
  0x75   : > { %2219 = vrot.lane.b32.xlu1 %v3182_v29, %s2654_s20 }
  0x77   : > { %2214 = vrot.lane.b32.xlu0 %v3189_v52, %s2654_s20 }
  0x79   : > { %2229 = vrot.lane.b32.xlu1 %v4219_v46, %s2655_s21 }
  0x7b   : > { %2224 = vrot.lane.b32.xlu0 %v4220_v54, %s2655_s21 }
  0x7d   : > { %2239 = vrot.lane.b32.xlu1 %v4221_v18, %s2655_s21 }
  0x7f   : > { %2234 = vrot.lane.b32.xlu0 %v4223_v56, %s2655_s21 }
  0x81   : > { %2249 = vrot.lane.b32.xlu1 %v2998_v47, %s2656_s22 }
  0x83   : > { %2244 = vrot.lane.b32.xlu0 %v2950_v27, %s2655_s21 }
  0x85   : > { %2259 = vrot.lane.b32.xlu1 %v3024_v16, %s2656_s22 }
  0x87   : > { %2254 = vrot.lane.b32.xlu0 %v3063_v39, %s2656_s22 }
  0x89   : > { %2269 = vrot.lane.b32.xlu1 %v2148_v28, %s2657_s23  ;;  %v2624_v28 = vld [vmem:[%s4151_s1 + $0x8] sm:$0xff]  }
  0x8a   : > { %1922 = vmatprep.subr.bf16.mxu0 %v2624_v28  ;;  %1959 = vmatprep.subr.bf16.mxu1 %v2624_v28 }
  0x8b   : > { %2264 = vrot.lane.b32.xlu0 %v3087_v45, %s2656_s22  ;;  %v3225_v47 = vpop.permute.xlu1 %1994  ;;  %1923 = vmatpush3.bf16.msra.mxu0 %v2624_v28 }
  0x8c   : > { %1962 = vmatpush3.bf16.msra.mxu1 %v2624_v28 }
  0x8d   : > { %v3227_v6 = vpop.permute.xlu0 %1984  ;;  %2279 = vrot.lane.b32.xlu1 %v2153_v37, %s2657_s23  ;;  %v2625_v37 = vld [vmem:[%s4151_s1 + $0x10] ss:$0 sps:$4 sm:$0x33]  }
  0x8e   : > { %1964 = vmatprep.subr.msk.bf16.mxu0 %vm1586_vm2, %v2625_v37  ;;  %1965 = vmatprep.subr.msk.bf16.mxu1 %vm1586_vm2, %v2625_v37  ;;  %v1588_v5 = vsel %vm1586_vm2, %v2625_v37, 0 }
  0x8f   : > { %2274 = vrot.lane.b32.xlu0 %v2188_v17, %s2657_s23  ;;  %v3234_v32 = vpop.permute.xlu1 %1999  ;;  %1925 = vmatpush3.bf16.msra.mxu0 %v1588_v5 }
  0x90   : > { %4224 = vst [vmem:[#allocation13_spill] sm:$0xff] %v3234_v32  ;;  %1963 = vmatpush3.bf16.msra.mxu1 %v1588_v5 }
  0x91   : > { %v3236_v44 = vpop.permute.xlu0 %1989  ;;  %2289 = vrot.lane.b32.xlu1 %v4219_v46, %s2658_s28 }
  0x93   : > { %2284 = vrot.lane.b32.xlu0 %v2193_v10, %s2657_s23  ;;  %v3244_v33 = vpop.permute.xlu1 %2009 }
  0x95   : > { %v3246_v17 = vpop.permute.xlu0 %2004  ;;  %2299 = vrot.lane.b32.xlu1 %v4223_v56, %s2658_s28 }
  0x97   : > { %2294 = vrot.lane.b32.xlu0 %v2950_v27, %s2658_s28  ;;  %v3252_v23 = vpop.permute.xlu1 %2019 }
  0x99   : > { %v3254_v4 = vpop.permute.xlu0 %2014  ;;  %2309 = vrot.lane.b32.xlu1 %v3024_v16, %s2659_s4 }
  0x9b   : > { %2304 = vrot.lane.b32.xlu0 %v2932_v19, %s2658_s28  ;;  %v3260_v10 = vpop.permute.xlu1 %2029 }
  0x9d   : > { %v3262_v46 = vpop.permute.xlu0 %2024  ;;  %2319 = vrot.lane.b32.xlu1 %v3009_v7, %s2659_s4 }
  0x9f   : > { %2314 = vrot.lane.b32.xlu0 %v3087_v45, %s2659_s4  ;;  %v3268_v27 = vpop.permute.xlu1 %2039 }
  0xa0   : > { %4225 = vst [vmem:[#allocation14_spill] sm:$0xff] %v3268_v27 }
  0xa1   : > { %v3270_v15 = vpop.permute.xlu0 %2034  ;;  %2329 = vrot.lane.b32.xlu1 %v2932_v19, %s2655_s21 }
  0xa2   : > { %4226 = vst [vmem:[#allocation2_spill] sm:$0xff] %v3270_v15 }
  0xa3   : > { %2324 = vrot.lane.b32.xlu0 %v3085_v21, %s2659_s4  ;;  %v3276_v16 = vpop.permute.xlu1 %2049 }
  0xa5   : > { %v3278_v54 = vpop.permute.xlu0 %2044  ;;  %2339 = vrot.lane.b32.xlu1 %v2968_v58, %s2655_s21 }
  0xa7   : > { %2334 = vrot.lane.b32.xlu0 %v4227_v11, %s2655_s21  ;;  %v2060_v45 = vpop.permute.xlu1 %2059 }
  0xa8   : > { %v2061_v15 = vunpack.i.l.bf16 %v2060_v45 }
  0xa9   : > { %v2055_v12 = vpop.permute.xlu0 %2054  ;;  %2349 = vrot.lane.b32.xlu1 %v3085_v21, %s2656_s22 }
  0xaa   : > { %v2057_v32 = vunpack.i.h.bf16 %v2055_v12  ;;  %v2056_v39 = vunpack.i.l.bf16 %v2055_v12 }
  0xab   : > { %2344 = vrot.lane.b32.xlu0 %v3009_v7, %s2656_s22  ;;  %v3288_v19 = vpop.permute.xlu1 %2069 }
  0xad   : > { %v3290_v56 = vpop.permute.xlu0 %2064  ;;  %2359 = vrot.lane.b32.xlu1 %v3106_v55, %s2656_s22 }
  0xaf   : > { %2354 = vrot.lane.b32.xlu0 %v3033_v59, %s2656_s22  ;;  %v3296_v41 = vpop.permute.xlu1 %2079 }
  0xb0   : > { %4228 = vst [vmem:[#allocation4_spill] sm:$0xff] %v3296_v41 }
  0xb1   : > { %v3298_v28 = vpop.permute.xlu0 %2074  ;;  %2369 = vrot.lane.b32.xlu1 %v3162_v9, %s2657_s23 }
  0xb3   : > { %2364 = vrot.lane.b32.xlu0 %v3129_v62, %s2657_s23  ;;  %v3304_v7 = vpop.permute.xlu1 %2089 }
  0xb5   : > { %v3306_v21 = vpop.permute.xlu0 %2084  ;;  %2379 = vrot.lane.b32.xlu1 %v3178_v61, %s2657_s23  ;;  %v4229_v61 = vld [vmem:[#allocation5_spill] sm:$0xff] }
  0xb7   : > { %2374 = vrot.lane.b32.xlu0 %v3143_v1, %s2657_s23  ;;  %v3312_v37 = vpop.permute.xlu1 %2099 }
  0xb9   : > { %v3314_v5 = vpop.permute.xlu0 %2094  ;;  %2389 = vrot.lane.b32.xlu1 %v2968_v58, %s2658_s28 }
  0xbb   : > { %2384 = vrot.lane.b32.xlu0 %v4227_v11, %s2658_s28  ;;  %v3320_v62 = vpop.permute.xlu1 %2109  ;;  %v2062_v11 = vunpack.i.h.bf16 %v2060_v45  ;;  %v1261_v45 = vsel %vm1230_vm3, %v4216_v35, %v2061_v15 }
  0xbd   : > { %v3322_v9 = vpop.permute.xlu0 %2104  ;;  %2399 = vrot.lane.b32.xlu1 %v2959_v57, %s2658_s28 }
  0xbf   : > { %2394 = vrot.lane.b32.xlu0 %v4229_v61, %s2658_s28  ;;  %v3328_v1 = vpop.permute.xlu1 %2119 }
  0xc0   : > { %4230 = vst [vmem:[#allocation3_spill] sm:$0xff] %v3328_v1 }
  0xc1   : > { %v3330_v41 = vpop.permute.xlu0 %2114  ;;  %2409 = vrot.lane.b32.xlu1 %v3106_v55, %s2659_s4 }
  0xc2   : > { %4231 = vst [vmem:[#allocation6_spill] sm:$0xff] %v3330_v41 }
  0xc3   : > { %2404 = vrot.lane.b32.xlu0 %v3033_v59, %s2659_s4  ;;  %v3336_v58 = vpop.permute.xlu1 %2129  ;;  %v1262_v59 = vsel %vm1230_vm3, %v4217_v8, %v2062_v11  ;;  %v1259_v8 = vsel %vm1230_vm3, %v2937_v53, %v2056_v39  ;;  %v2011_v53 = vunpack.i.l.bf16 %v3244_v33  ;;  %v2007_v39 = vunpack.i.h.bf16 %v3246_v17 }
  0xc4   : > { %v2092_v11 = vunpack.i.h.bf16 %v3304_v7 }
  0xc5   : > { %v3338_v27 = vpop.permute.xlu0 %2124  ;;  %2419 = vrot.lane.b32.xlu1 %v3089_v38, %s2659_s4 }
  0xc7   : > { %2414 = vrot.lane.b32.xlu0 %v3029_v51, %s2659_s4  ;;  %v2140_v41 = vpop.permute.xlu1 %2139 }
  0xc8   : > { %v2142_v55 = vunpack.i.h.bf16 %v2140_v41  ;;  %v2141_v1 = vunpack.i.l.bf16 %v2140_v41  ;;  %v1260_v41 = vsel %vm1230_vm3, %v2940_v22, %v2057_v32  ;;  %v2012_v22 = vunpack.i.h.bf16 %v3244_v33 }
  0xc9   : > { %v2135_v18 = vpop.permute.xlu0 %2134  ;;  %2429 = vrot.lane.b32.xlu1 %v2959_v57, %s2655_s21  ;;  %v2022_v32 = vunpack.i.h.bf16 %v3252_v23 }
  0xca   : > { %v3351_v12 = vsel %vm1263_vm4, %v1262_v59, %v2142_v55  ;;  %v3354_v29 = vsel %vm1263_vm4, %v1261_v45, %v2141_v1  ;;  %v2137_v26 = vunpack.i.h.bf16 %v2135_v18  ;;  %v2136_v34 = vunpack.i.l.bf16 %v2135_v18 }
  0xcb   : > { %2424 = vrot.lane.b32.xlu0 %v4229_v61, %s2655_s21  ;;  %v3362_v35 = vpop.permute.xlu1 %2149  ;;  %v2006_v18 = vunpack.i.l.bf16 %v3246_v17  ;;  %v2091_v55 = vunpack.i.l.bf16 %v3304_v7  ;;  %v1242_v33 = vsel %vm1230_vm3, %v2749_v25, %v2012_v22  ;;  %v1241_v17 = vsel %vm1230_vm3, %v2746_v24, %v2011_v53 }
  0xcc   : > { %v3365_v57 = vsel %vm1263_vm4, %v1259_v8, %v2136_v34  ;;  %v3368_v15 = vsel %vm1263_vm4, %v1260_v41, %v2137_v26  ;;  %v2021_v34 = vunpack.i.l.bf16 %v3252_v23  ;;  %v4232_v26 = vld [vmem:[#allocation8_spill] sm:$0xff]  ;;  %v1240_v23 = vsel %vm1230_vm3, %v2767_v36, %v2007_v39 }
  0xcd   : > { %v3370_v1 = vpop.permute.xlu0 %2144  ;;  %2439 = vrot.lane.b32.xlu1 %v2987_v13, %s2655_s21  ;;  %v1239_v45 = vsel %vm1230_vm3, %v2759_v31, %v2006_v18  ;;  %v1246_v7 = vsel %vm1230_vm3, %v2780_v43, %v2022_v32  ;;  %v2086_v8 = vunpack.i.l.bf16 %v3306_v21  ;;  %v2017_v25 = vunpack.i.h.bf16 %v3254_v4 }
  0xce   : > { %v1245_v41 = vsel %vm1230_vm3, %v2777_v42, %v2021_v34  ;;  %v2016_v36 = vunpack.i.l.bf16 %v3254_v4  ;;  %v1275_v53 = vsel %vm1263_vm4, %v1242_v33, %v2092_v11  ;;  %v1274_v43 = vsel %vm1263_vm4, %v1241_v17, %v2091_v55 }
  0xcf   : > { %2434 = vrot.lane.b32.xlu0 %v4232_v26, %s2655_s21  ;;  %v3382_v61 = vpop.permute.xlu1 %2159  ;;  %v2102_v42 = vunpack.i.h.bf16 %v3312_v37  ;;  %v2101_v39 = vunpack.i.l.bf16 %v3312_v37  ;;  %v1272_v34 = vsel %vm1263_vm4, %v1239_v45, %v2086_v8  ;;  %v2097_v55 = vunpack.i.h.bf16 %v3314_v5 }
  0xd0   : > { %v2096_v37 = vunpack.i.l.bf16 %v3314_v5  ;;  %v1243_v5 = vsel %vm1230_vm3, %v2792_v49, %v2016_v36 }
  0xd1   : > { %v3386_v59 = vpop.permute.xlu0 %2154  ;;  %2449 = vrot.lane.b32.xlu1 %v3089_v38, %s2656_s22  ;;  %v2087_v38 = vunpack.i.h.bf16 %v3306_v21  ;;  %v1279_v45 = vsel %vm1263_vm4, %v1246_v7, %v2102_v42 }
  0xd3   : > { %2444 = vrot.lane.b32.xlu0 %v3029_v51, %s2656_s22  ;;  %v2170_v24 = vpop.permute.xlu1 %2169  ;;  %v1273_v11 = vsel %vm1263_vm4, %v1240_v23, %v2087_v38  ;;  %v1244_v23 = vsel %vm1230_vm3, %v2795_v50, %v2017_v25  ;;  %v1278_v38 = vsel %vm1263_vm4, %v1245_v41, %v2101_v39  ;;  %v1276_v50 = vsel %vm1263_vm4, %v1243_v5, %v2096_v37  ;;  %v2626_v41 = vld [vmem:[%s2694_s17 + $0xa8] sm:$0xff]  ;;  %v2627_v25 = vld [vmem:[%s2694_s17 + $0xb0] sm:$0xff] }
  0xd4   : > { %v2172_v22 = vunpack.i.h.bf16 %v2170_v24  ;;  %v2171_v31 = vunpack.i.l.bf16 %v2170_v24  ;;  %v1277_v49 = vsel %vm1263_vm4, %v1244_v23, %v2097_v55  ;;  %v2046_v55 = vunpack.i.l.bf16 %v3278_v54 }
  0xd5   : > { %v2165_v18 = vpop.permute.xlu0 %2164  ;;  %2459 = vrot.lane.b32.xlu1 %v3116_v20, %s2656_s22  ;;  %v2132_v37 = vunpack.i.h.bf16 %v3336_v58 }
  0xd6   : > { %v3415_v51 = vsel %vm1296_vm5, %v1274_v43, %v2171_v31  ;;  %v3418_v21 = vsel %vm1296_vm5, %v1275_v53, %v2172_v22  ;;  %v2167_v4 = vunpack.i.h.bf16 %v2165_v18  ;;  %v2166_v32 = vunpack.i.l.bf16 %v2165_v18 }
  0xd7   : > { %2454 = vrot.lane.b32.xlu0 %v3059_v2, %s2656_s22  ;;  %v2180_v33 = vpop.permute.xlu1 %2179 }
  0xd8   : > { %v3427_v17 = vsel %vm1296_vm5, %v1272_v34, %v2166_v32  ;;  %v3430_v24 = vsel %vm1296_vm5, %v1273_v11, %v2167_v4  ;;  %v2182_v22 = vunpack.i.h.bf16 %v2180_v33  ;;  %v2181_v31 = vunpack.i.l.bf16 %v2180_v33 }
  0xd9   : > { %v2175_v8 = vpop.permute.xlu0 %2174  ;;  %2469 = vrot.lane.b32.xlu1 %v3171_v40, %s2657_s23  ;;  %v2473_v40 = vpack.i.bf16 %v2627_v25, %v2626_v41  ;;  %v2051_v34 = vunpack.i.l.bf16 %v3276_v16  ;;  %v2047_v11 = vunpack.i.h.bf16 %v3278_v54  ;;  %v2131_v33 = vunpack.i.l.bf16 %v3336_v58 }
  0xda   : > { %v3441_v53 = vsel %vm1296_vm5, %v1278_v38, %v2181_v31  ;;  %v3444_v43 = vsel %vm1296_vm5, %v1279_v45, %v2182_v22  ;;  %v2177_v18 = vunpack.i.h.bf16 %v2175_v8  ;;  %v2176_v4 = vunpack.i.l.bf16 %v2175_v8  ;;  %v4237_v8 = vld [vmem:[#allocation16_spill] sm:$0xff] }
  0xdb   : > { %4233 = vst [vmem:[#allocation5_spill] sm:$0xff] %v3441_v53  ;;  %4234 = vst [vmem:[#allocation8_spill] sm:$0xff] %v3444_v43  ;;  %2464 = vrot.lane.b32.xlu0 %v3138_v0, %s2657_s23  ;;  %v3450_v7 = vpop.permute.xlu1 %2189  ;;  %v2052_v0 = vunpack.i.h.bf16 %v3276_v16  ;;  %v2126_v31 = vunpack.i.l.bf16 %v3338_v27  ;;  %v1257_v23 = vsel %vm1230_vm3, %v2881_v60, %v2051_v34  ;;  %v1256_v45 = vsel %vm1230_vm3, %v4213_v14, %v2047_v11  ;;  %v2637_v43 = vld [vmem:[%s2694_s17 + $0x18] sm:$0xff] }
  0xdc   : > { %v3455_v36 = vsel %vm1296_vm5, %v1276_v50, %v2176_v4  ;;  %v3458_v42 = vsel %vm1296_vm5, %v1277_v49, %v2177_v18  ;;  %v1290_v38 = vsel %vm1263_vm4, %v1257_v23, %v2131_v33  ;;  %v4238_v50 = vld [vmem:[#allocation7_spill] sm:$0xff]  ;;  %v1997_v23 = vunpack.i.h.bf16 %v3225_v47 }
  0xdd   : > { %4235 = vst [vmem:[#allocation19_spill] sm:$0xff] %v3455_v36  ;;  %4236 = vst [vmem:[#allocation20_spill] sm:$0xff] %v3458_v42  ;;  %v3460_v39 = vpop.permute.xlu0 %2184  ;;  %2479 = vrot.lane.b32.xlu1 %v3189_v52, %s2657_s23  ;;  %v2127_v52 = vunpack.i.h.bf16 %v3338_v27  ;;  %v1258_v54 = vsel %vm1230_vm3, %v2884_v63, %v2052_v0  ;;  %v2147_v36 = vunpack.i.h.bf16 %v3370_v1 }
  0xde   : > { %v1291_v27 = vsel %vm1263_vm4, %v1258_v54, %v2132_v37 }
  0xdf   : > { %2474 = vrot.lane.b32.xlu0 %v2473_v40, %s2657_s23  ;;  %v3465_v32 = vpop.permute.xlu1 %2199 }
  0xe1   : > { %v3473_v22 = vpop.permute.xlu0 %2194  ;;  %2489 = vrot.lane.b32.xlu1 %v2987_v13, %s2658_s28  ;;  %v1255_v13 = vsel %vm1230_vm3, %v4212_v3, %v2046_v55  ;;  %v1289_v3 = vsel %vm1263_vm4, %v1256_v45, %v2127_v52  ;;  %v3520_v52 = vld [vmem:[%s2694_s17 + $0x1a8] sm:$0x3]  ;;  %v2076_v45 = vunpack.i.l.bf16 %v3298_v28 }
  0xe2   : > { %v1288_v4 = vsel %vm1263_vm4, %v1255_v13, %v2126_v31  ;;  %v2157_v13 = vunpack.i.h.bf16 %v3386_v59 }
  0xe3   : > { %2484 = vrot.lane.b32.xlu0 %v4232_v26, %s2658_s28  ;;  %v2210_v16 = vpop.permute.xlu1 %2209 }
  0xe4   : > { %v2212_v58 = vunpack.i.h.bf16 %v2210_v16  ;;  %v2211_v5 = vunpack.i.l.bf16 %v2210_v16  ;;  %v3527_v16 = vld [vmem:[%s2694_s17 + $0x1a0] sm:$0xff] }
  0xe5   : > { %v2205_v26 = vpop.permute.xlu0 %2204  ;;  %2499 = vrot.lane.b32.xlu1 %v4237_v8, %s2658_s28  ;;  %v453_v54 = vrot.slane %v3527_v16, 1 }
  0xe6   : > { %v3494_v63 = vsel %vm1296_vm5, %v1290_v38, %v2211_v5  ;;  %v3497_v60 = vsel %vm1296_vm5, %v1291_v27, %v2212_v58  ;;  %v2207_v18 = vunpack.i.h.bf16 %v2205_v26  ;;  %v2206_v14 = vunpack.i.l.bf16 %v2205_v26 }
  0xe7   : > { %2494 = vrot.lane.b32.xlu0 %v4238_v50, %s2658_s28  ;;  %v2220_v49 = vpop.permute.xlu1 %2219  ;;  %v2077_v5 = vunpack.i.h.bf16 %v3298_v28  ;;  %v2156_v27 = vunpack.i.l.bf16 %v3386_v59  ;;  %v458_v26 = vrot.slane %v3527_v16, 2 }
  0xe8   : > { %v3504_v41 = vsel %vm1296_vm5, %v1288_v4, %v2206_v14  ;;  %v3507_v25 = vsel %vm1296_vm5, %v1289_v3, %v2207_v18  ;;  %v2222_v40 = vunpack.i.h.bf16 %v2220_v49  ;;  %v2221_v0 = vunpack.i.l.bf16 %v2220_v49  ;;  %v2628_v14 = vld [vmem:[%s2694_s17 + $0x38] sm:$0xff]  ;;  %v2629_v3 = vld [vmem:[%s2694_s17 + $0x30] sm:$0xff] }
  0xe9   : > { %v2215_v34 = vpop.permute.xlu0 %2214  ;;  %2509 = vrot.lane.b32.xlu1 %v3116_v20, %s2659_s4  ;;  %v1236_v4 = vsel %vm1230_vm3, %v2628_v14, %v1997_v23  ;;  %v1987_v23 = vunpack.i.h.bf16 %v3227_v6  ;;  %v1992_v14 = vunpack.i.h.bf16 %v3236_v44 }
  0xea   : > { %v3513_v11 = vsel %vm1296_vm5, %v3354_v29, %v2221_v0  ;;  %v3517_v55 = vsel %vm1296_vm5, %v3351_v12, %v2222_v40  ;;  %v2217_v37 = vunpack.i.h.bf16 %v2215_v34  ;;  %v2216_v33 = vunpack.i.l.bf16 %v2215_v34  ;;  %v3538_v12 = vld [vmem:[%s2694_s17 + $0x198] sm:$0xff] }
  0xeb   : > { %4239 = vst [vmem:[#allocation16_spill] sm:$0xff] %v3513_v11  ;;  %4240 = vst [vmem:[#allocation7_spill] sm:$0xff] %v3517_v55  ;;  %2504 = vrot.lane.b32.xlu0 %v3059_v2, %s2659_s4  ;;  %v3524_v31 = vpop.permute.xlu1 %2229  ;;  %v1996_v2 = vunpack.i.l.bf16 %v3225_v47  ;;  %v4243_v47 = vld [vmem:[#allocation17_spill] sm:$0xff]  ;;  %v457_v18 = vrot.slane %v3538_v12, 2  ;;  %v1269_v0 = vsel %vm1263_vm4, %v1236_v4, %v2077_v5  ;;  %v2072_v11 = vunpack.i.h.bf16 %v3288_v19 }
  0xec   : > { %v3531_v20 = vsel %vm1296_vm5, %v3365_v57, %v2216_v33  ;;  %v3535_v29 = vsel %vm1296_vm5, %v3368_v15, %v2217_v37  ;;  %v452_v57 = vrot.slane %v3538_v12, 1  ;;  %v455_v15 = vrot.slane %v3520_v52, 1 }
  0xed   : > { %4241 = vst [vmem:[#allocation21_spill] sm:$0xff] %v3531_v20  ;;  %4242 = vst [vmem:[#allocation22_spill] sm:$0xff] %v3535_v29  ;;  %v3543_v58 = vpop.permute.xlu0 %2224  ;;  %2519 = vrot.lane.b32.xlu1 %v3112_v30, %s2659_s4  ;;  %v1235_v28 = vsel %vm1230_vm3, %v2629_v3, %v1996_v2  ;;  %v3605_v3 = vld [vmem:[%s2694_s17 + $0xd8] sm:$0xff]  ;;  %v3623_v4 = vsel %vm355_vm1, %v457_v18, %v458_v26  ;;  %v2071_v18 = vunpack.i.l.bf16 %v3288_v19  ;;  %v2112_v19 = vunpack.i.h.bf16 %v3320_v62 }
  0xee   : > { %v3566_v59 = vsel %vm274_vm0, %v452_v57, %v453_v54  ;;  %v3569_v40 = vsel %vm274_vm0, %v453_v54, %v455_v15  ;;  %v1268_v34 = vsel %vm1263_vm4, %v1235_v28, %v2076_v45  ;;  %v460_v54 = vrot.slane %v3520_v52, 2  ;;  %v3608_v28 = vld [vmem:[%s2694_s17 + $0xe0] sm:$0xff]  ;;  %v4246_v29 = vld [vmem:[#allocation9_spill] sm:$0xff] }
  0xef   : > { %2514 = vrot.lane.b32.xlu0 %v4243_v47, %s2659_s4  ;;  %v3555_v38 = vpop.permute.xlu1 %2239  ;;  %v1301_v2 = vsel %vm1296_vm5, %v1268_v34, %v2156_v27  ;;  %v1986_v15 = vunpack.i.l.bf16 %v3227_v6  ;;  %v3589_v27 = vld [vmem:[%s2694_s17 + $0xc0] sm:$0xff]  ;;  %v1991_v52 = vunpack.i.l.bf16 %v3236_v44  ;;  %v2032_v44 = vunpack.i.h.bf16 %v3260_v10  ;;  %v2634_v34 = vld [vmem:[%s2694_s17 + $0x8] sm:$0xff] }
  0xf1   : > { %v2235_v49 = vpop.permute.xlu0 %2234  ;;  %2529 = vrot.lane.b32.xlu1 %v4237_v8, %s2655_s21  ;;  %v1302_v8 = vsel %vm1296_vm5, %v1269_v0, %v2157_v13  ;;  %v3592_v13 = vld [vmem:[%s2694_s17 + $0xc8] sm:$0xff]  ;;  %v2027_v0 = vunpack.i.h.bf16 %v3262_v46  ;;  %v1233_v55 = vsel %vm1230_vm3, %v2637_v43, %v1991_v52 }
  0xf2   : > { %v2237_v37 = vunpack.i.h.bf16 %v2235_v49  ;;  %v2236_v33 = vunpack.i.l.bf16 %v2235_v49  ;;  %v3626_v49 = vsel %vm355_vm1, %v458_v26, %v460_v54  ;;  %v1250_v26 = vsel %vm1230_vm3, %v3608_v28, %v2032_v44 }
  0xf3   : > { %2524 = vrot.lane.b32.xlu0 %v4238_v50, %s2655_s21  ;;  %v3578_v57 = vpop.permute.xlu1 %2249  ;;  %v2635_v50 = vld [vmem:[%s2694_s17] sm:$0xff]  ;;  %v2107_v44 = vunpack.i.h.bf16 %v3322_v9 }
  0xf4   : > { %v3583_v5 = vsel %vm1329_vm6, %v1301_v2, %v2236_v33  ;;  %v3586_v45 = vsel %vm1329_vm6, %v1302_v8, %v2237_v37  ;;  %v1232_v37 = vsel %vm1230_vm3, %v2634_v34, %v1987_v23  ;;  %v2031_v33 = vunpack.i.l.bf16 %v3260_v10  ;;  %v4244_v2 = vld [vmem:[#allocation15_spill] sm:$0xff]  ;;  %v2636_v34 = vld [vmem:[%s2694_s17 + $0x20] sm:$0xff] }
  0xf5   : > { %v3598_v6 = vpop.permute.xlu0 %2244  ;;  %2539 = vrot.lane.b32.xlu1 %v3195_v48, %s2655_s21  ;;  %v1231_v53 = vsel %vm1230_vm3, %v2635_v50, %v1986_v15  ;;  %v2026_v23 = vunpack.i.l.bf16 %v3262_v46  ;;  %v1234_v10 = vsel %vm1230_vm3, %v2636_v34, %v1992_v14  ;;  %v2066_v46 = vunpack.i.l.bf16 %v3290_v56 }
  0xf6   : > { %v1249_v43 = vsel %vm1230_vm3, %v3605_v3, %v2031_v33  ;;  %v2067_v15 = vunpack.i.h.bf16 %v3290_v56  ;;  %v2111_v50 = vunpack.i.l.bf16 %v3320_v62  ;;  %v1248_v14 = vsel %vm1230_vm3, %v3592_v13, %v2027_v0  ;;  %v4245_v0 = vld [vmem:[#allocation12_spill] sm:$0xff] }
  0xf7   : > { %2534 = vrot.lane.b32.xlu0 %v4244_v2, %s2655_s21  ;;  %v3620_v8 = vpop.permute.xlu1 %2259  ;;  %v1247_v52 = vsel %vm1230_vm3, %v3589_v27, %v2026_v23  ;;  %v2106_v33 = vunpack.i.l.bf16 %v3322_v9  ;;  %v1266_v56 = vsel %vm1263_vm4, %v1233_v55, %v2071_v18  ;;  %v1267_v34 = vsel %vm1263_vm4, %v1234_v10, %v2072_v11 }
  0xf8   : > { %v2152_v62 = vunpack.i.h.bf16 %v3362_v35  ;;  %v1264_v23 = vsel %vm1263_vm4, %v1231_v53, %v2066_v46  ;;  %v2146_v9 = vunpack.i.l.bf16 %v3370_v1  ;;  %v2191_v55 = vunpack.i.l.bf16 %v3450_v7 }
  0xf9   : > { %v3638_v42 = vpop.permute.xlu0 %2254  ;;  %2549 = vrot.lane.b32.xlu1 %v3112_v30, %s2656_s22  ;;  %v1265_v11 = vsel %vm1263_vm4, %v1232_v37, %v2067_v15  ;;  %v1283_v10 = vsel %vm1263_vm4, %v1250_v26, %v2112_v19  ;;  %v2192_v18 = vunpack.i.h.bf16 %v3450_v7  ;;  %v1280_v53 = vsel %vm1263_vm4, %v1247_v52, %v2106_v33 }
  0xfa   : > { %v1281_v1 = vsel %vm1263_vm4, %v1248_v14, %v2107_v44  ;;  %v2187_v46 = vunpack.i.h.bf16 %v3460_v39  ;;  %v2186_v37 = vunpack.i.l.bf16 %v3460_v39  ;;  %v2232_v7 = vunpack.i.h.bf16 %v3524_v31 }
  0xfb   : > { %2544 = vrot.lane.b32.xlu0 %v4243_v47, %s2656_s22  ;;  %v3654_v30 = vpop.permute.xlu1 %2269  ;;  %v2151_v47 = vunpack.i.l.bf16 %v3362_v35  ;;  %v1282_v35 = vsel %vm1263_vm4, %v1249_v43, %v2111_v50  ;;  %v1300_v43 = vsel %vm1296_vm5, %v1267_v34, %v2152_v62  ;;  %v2231_v15 = vunpack.i.l.bf16 %v3524_v31  ;;  %v4247_v50 = vld [vmem:[#allocation10_spill] sm:$0xff] }
  0xfc   : > { %v1297_v14 = vsel %vm1296_vm5, %v1264_v23, %v2146_v9  ;;  %v1298_v52 = vsel %vm1296_vm5, %v1265_v11, %v2147_v36  ;;  %v3697_v39 = vsel %vm1296_vm5, %v1282_v35, %v2191_v55  ;;  %v2226_v44 = vunpack.i.l.bf16 %v3543_v58 }
  0xfd   : > { %v3666_v54 = vpop.permute.xlu0 %2264  ;;  %2559 = vrot.lane.b32.xlu1 %v4245_v0, %s2656_s22  ;;  %v1299_v26 = vsel %vm1296_vm5, %v1266_v56, %v2151_v47  ;;  %v3701_v33 = vsel %vm1296_vm5, %v1283_v10, %v2192_v18  ;;  %v2227_v31 = vunpack.i.h.bf16 %v3543_v58  ;;  %v2242_v56 = vunpack.i.h.bf16 %v3555_v38 }
  0xfe   : > { %v2241_v34 = vunpack.i.l.bf16 %v3555_v38  ;;  %v4248_v62 = vpack.i.bf16 %v3592_v13, %v3589_v27  ;;  %v1313_v47 = vsel %vm1296_vm5, %v1280_v53, %v2186_v37  ;;  %v1314_v23 = vsel %vm1296_vm5, %v1281_v1, %v2187_v46 }
  0xff   : > { %2554 = vrot.lane.b32.xlu0 %v4246_v29, %s2656_s22  ;;  %v3680_v20 = vpop.permute.xlu1 %2279  ;;  %v2252_v9 = vunpack.i.h.bf16 %v3578_v57  ;;  %v2251_v55 = vunpack.i.l.bf16 %v3578_v57  ;;  %v1332_v58 = vsel %vm1329_vm6, %v1299_v26, %v2231_v15  ;;  %v1333_v11 = vsel %vm1329_vm6, %v1300_v43, %v2232_v7 }
 0x100   : > { %v2262_v38 = vunpack.i.h.bf16 %v3620_v8  ;;  %v2261_v10 = vunpack.i.l.bf16 %v3620_v8  ;;  %v4249_v13 = vpack.i.bf16 %v3527_v16, %v3538_v12  ;;  %v1330_v35 = vsel %vm1329_vm6, %v1297_v14, %v2226_v44 }
 0x101   : > { %v3690_v19 = vpop.permute.xlu0 %2274  ;;  %2569 = vrot.lane.b32.xlu1 %v4247_v50, %s2657_s23  ;;  %v2257_v18 = vunpack.i.h.bf16 %v3638_v42  ;;  %v2256_v57 = vunpack.i.l.bf16 %v3638_v42  ;;  %v2271_v53 = vunpack.i.l.bf16 %v3654_v30  ;;  %v1331_v1 = vsel %vm1329_vm6, %v1298_v52, %v2227_v31 }
 0x102   : > { %v1346_v8 = vsel %vm1329_vm6, %v1313_v47, %v2241_v34  ;;  %v1347_v46 = vsel %vm1329_vm6, %v1314_v23, %v2242_v56  ;;  %v2272_v37 = vunpack.i.h.bf16 %v3654_v30  ;;  %v4250_v16 = vpack.i.bf16 %v3608_v28, %v3605_v3 }
 0x103   : > { %2564 = vrot.lane.b32.xlu0 %v4248_v62, %s2657_s23  ;;  %v2290_v36 = vpop.permute.xlu1 %2289  ;;  %v1363_v26 = vsel %vm1362_vm7, %v1330_v35, %v2251_v55  ;;  %v1364_v42 = vsel %vm1362_vm7, %v1331_v1, %v2252_v9  ;;  %v2247_v43 = vunpack.i.h.bf16 %v3598_v6  ;;  %v2246_v15 = vunpack.i.l.bf16 %v3598_v6  ;;  %v4252_v1 = vld [vmem:[#allocation11_spill] sm:$0xff] }
 0x104   : > { %v2291_v7 = vunpack.i.l.bf16 %v2290_v36  ;;  %v1365_v50 = vsel %vm1362_vm7, %v1332_v58, %v2261_v10  ;;  %v1366_v14 = vsel %vm1362_vm7, %v1333_v11, %v2262_v38  ;;  %v2292_v30 = vunpack.i.h.bf16 %v2290_v36 }
 0x105   : > { %v3718_v27 = vpop.permute.xlu0 %2284  ;;  %2579 = vrot.lane.b32.xlu1 %v4249_v13, %s2657_s23  ;;  %v1379_v3 = vsel %vm1362_vm7, %v1346_v8, %v2256_v57  ;;  %v1380_v28 = vsel %vm1362_vm7, %v1347_v46, %v2257_v18  ;;  %v1396_v44 = vsel %vm1395_vm8, %v1363_v26, %v2271_v53  ;;  %v2281_v31 = vunpack.i.l.bf16 %v3680_v20 }
 0x106   : > { %v1397_v56 = vsel %vm1395_vm8, %v1364_v42, %v2272_v37  ;;  %v2267_v6 = vunpack.i.h.bf16 %v3666_v54  ;;  %v2282_v34 = vunpack.i.h.bf16 %v3680_v20  ;;  %v2276_v62 = vunpack.i.l.bf16 %v3690_v19 }
 0x107   : > { %2574 = vrot.lane.b32.xlu0 %v4250_v16, %s2657_s23  ;;  %v2300_v12 = vpop.permute.xlu1 %2299  ;;  %v2277_v36 = vunpack.i.h.bf16 %v3690_v19  ;;  %v1429_v9 = vsel %vm1428_vm9, %v1396_v44, %v2291_v7  ;;  %v4251_v20 = vpack.i.bf16 %v3569_v40, %v3566_v59  ;;  %v1430_v10 = vsel %vm1428_vm9, %v1397_v56, %v2292_v30 }
 0x108   : > { %v2302_v55 = vunpack.i.h.bf16 %v2300_v12  ;;  %v2301_v58 = vunpack.i.l.bf16 %v2300_v12  ;;  %v1398_v13 = vsel %vm1395_vm8, %v1365_v50, %v2281_v31  ;;  %v1399_v18 = vsel %vm1395_vm8, %v1366_v14, %v2282_v34 }
 0x109   : > { %v2295_v52 = vpop.permute.xlu0 %2294  ;;  %2589 = vrot.lane.b32.xlu1 %v3195_v48, %s2658_s28  ;;  %v1412_v57 = vsel %vm1395_vm8, %v1379_v3, %v2276_v62  ;;  %v1413_v8 = vsel %vm1395_vm8, %v1380_v28, %v2277_v36  ;;  %v2286_v16 = vunpack.i.l.bf16 %v3718_v27  ;;  %v1349_v31 = vsel %vm1329_vm6, %v3701_v33, %v2247_v43 }
 0x10a   : > { %v2296_v11 = vunpack.i.l.bf16 %v2295_v52  ;;  %v2297_v53 = vunpack.i.h.bf16 %v2295_v52  ;;  %v1431_v12 = vsel %vm1428_vm9, %v1398_v13, %v2301_v58  ;;  %v1432_v26 = vsel %vm1428_vm9, %v1399_v18, %v2302_v55 }
 0x10b   : > { %2584 = vrot.lane.b32.xlu0 %v4244_v2, %s2658_s28  ;;  %v2310_v48 = vpop.permute.xlu1 %2309  ;;  %v2266_v2 = vunpack.i.l.bf16 %v3666_v54  ;;  %v2287_v54 = vunpack.i.h.bf16 %v3718_v27  ;;  %v1348_v56 = vsel %vm1329_vm6, %v3697_v39, %v2246_v15  ;;  %v1382_v36 = vsel %vm1362_vm7, %v1349_v31, %v2267_v6  ;;  %v4254_v6 = vld [vmem:[#allocation18_spill] sm:$0xff]  ;;  %v2643_v31 = vld [vmem:[%s2694_s17 + $0xf0] sm:$0xff] }
 0x10c   : > { %v2312_v47 = vunpack.i.h.bf16 %v2310_v48  ;;  %v2311_v23 = vunpack.i.l.bf16 %v2310_v48  ;;  %v1445_v7 = vsel %vm1428_vm9, %v1412_v57, %v2296_v11 }
 0x10d   : > { %v2305_v38 = vpop.permute.xlu0 %2304  ;;  %2599 = vrot.lane.b32.xlu1 %v4251_v20, %s2658_s28  ;;  %v1381_v48 = vsel %vm1362_vm7, %v1348_v56, %v2266_v2  ;;  %v1415_v39 = vsel %vm1395_vm8, %v1382_v36, %v2287_v54  ;;  %v4255_v2 = vld [vmem:[#allocation13_spill] sm:$0xff] }
 0x10e   : > { %v1462_v19 = vsel %vm1461_vm10, %v1429_v9, %v2311_v23  ;;  %v1463_v35 = vsel %vm1461_vm10, %v1430_v10, %v2312_v47  ;;  %v2307_v3 = vunpack.i.h.bf16 %v2305_v38  ;;  %v2306_v27 = vunpack.i.l.bf16 %v2305_v38 }
 0x10f   : > { %2594 = vrot.lane.b32.xlu0 %v4252_v1, %s2658_s28  ;;  %v2320_v59 = vpop.permute.xlu1 %2319  ;;  %v1494_v40 = vpack.c.bf16 %v1463_v35, %v1462_v19  ;;  %v1414_v43 = vsel %vm1395_vm8, %v1381_v48, %v2286_v16  ;;  %v2002_v13 = vunpack.i.h.bf16 %v4255_v2  ;;  %v2001_v19 = vunpack.i.l.bf16 %v4255_v2  ;;  %v4256_v35 = vld [vmem:[#allocation14_spill] sm:$0xff] }
 0x110   : > { %v2322_v46 = vunpack.i.h.bf16 %v2320_v59  ;;  %v2321_v37 = vunpack.i.l.bf16 %v2320_v59  ;;  %v1447_v9 = vsel %vm1428_vm9, %v1414_v43, %v2306_v27  ;;  %v1448_v55 = vsel %vm1428_vm9, %v1415_v39, %v2307_v3  ;;  %v2641_v3 = vld [vmem:[%s2694_s17 + $0x108] sm:$0xff] }
 0x111   : > { %v2315_v42 = vpop.permute.xlu0 %2314  ;;  %2609 = vrot.lane.b32.xlu1 %v4245_v0, %s2659_s4  ;;  %1926 = vmatprep.mubr.msk.bf16.mxu0 %vm1537_vm11, %v1494_v40  ;;  %v1446_v0 = vsel %vm1428_vm9, %v1413_v8, %v2297_v53  ;;  %v2042_v18 = vunpack.i.h.bf16 %v4256_v35  ;;  %v2041_v57 = vunpack.i.l.bf16 %v4256_v35  ;;  %v4257_v53 = vld [vmem:[#allocation2_spill] sm:$0xff]  ;;  %v4258_v8 = vld [vmem:[#allocation4_spill] sm:$0xff]  ;;  %v2161_v43 = vunpack.i.l.bf16 %v3382_v61 }
 0x112   : > { %v1464_v50 = vsel %vm1461_vm10, %v1431_v12, %v2321_v37  ;;  %v1465_v14 = vsel %vm1461_vm10, %v1432_v26, %v2322_v46  ;;  %v2317_v30 = vunpack.i.h.bf16 %v2315_v42  ;;  %v2316_v52 = vunpack.i.l.bf16 %v2315_v42  ;;  %v4259_v37 = vld [vmem:[#allocation3_spill] sm:$0xff]  ;;  %v2638_v42 = vld [vmem:[%s2694_s17 + $0x50] sm:$0xff] }
 0x113   : > { %v1495_v28 = vpack.c.bf16 %v1465_v14, %v1464_v50  ;;  %2604 = vrot.lane.b32.xlu0 %v4246_v29, %s2659_s4  ;;  %v3782_v44 = vpop.permute.xlu1 %2329  ;;  %v4253_v29 = vpack.i.bf16 %v3626_v49, %v3623_v4  ;;  %v2037_v1 = vunpack.i.h.bf16 %v4257_v53  ;;  %v2036_v59 = vunpack.i.l.bf16 %v4257_v53  ;;  %v2639_v50 = vld [vmem:[%s2694_s17 + $0x48] sm:$0xff] }
 0x114   : > { %v1478_v34 = vsel %vm1461_vm10, %v1445_v7, %v2316_v52  ;;  %v1479_v62 = vsel %vm1461_vm10, %v1446_v0, %v2317_v30  ;;  %v2082_v54 = vunpack.i.h.bf16 %v4258_v8  ;;  %v2081_v46 = vunpack.i.l.bf16 %v4258_v8  ;;  %v2640_v30 = vld [vmem:[%s2694_s17 + $0x110] sm:$0xff] }
 0x115   : > { %v2325_v47 = vpop.permute.xlu0 %2324  ;;  %2619 = vrot.lane.b32.xlu1 %v4253_v29, %s2659_s4  ;;  %1927 = vmatmul.mubr.msk.bf16.vlgmr.msra.gmra.mrb[0].mxu0 %vm1537_vm11, %v1495_v28  ;;  %v1502_v33 = vpack.c.bf16 %v1479_v62, %v1478_v34  ;;  %v2122_v16 = vunpack.i.h.bf16 %v4259_v37  ;;  %v2121_v12 = vunpack.i.l.bf16 %v4259_v37  ;;  %v1238_v7 = vsel %vm1230_vm3, %v2638_v42, %v2002_v13  ;;  %v2642_v28 = vld [vmem:[%s2694_s17 + $0xf8] sm:$0xff]  ;;  %v4260_v34 = vld [vmem:[#allocation6_spill] sm:$0xff] }
 0x116   : > { %v2327_v15 = vunpack.i.h.bf16 %v2325_v47  ;;  %v2326_v23 = vunpack.i.l.bf16 %v2325_v47  ;;  %v1237_v14 = vsel %vm1230_vm3, %v2639_v50, %v2001_v19  ;;  %v1254_v52 = vsel %vm1230_vm3, %v2640_v30, %v2042_v18 }
 0x117   : > { %2614 = vrot.lane.b32.xlu0 %v4254_v6, %s2659_s4  ;;  %1942 = vmatprep.mubr.msk.bf16.mxu1 %vm1537_vm11, %v1502_v33  ;;  %v3805_v4 = vpop.permute.xlu1 %2339  ;;  %v1253_v27 = vsel %vm1230_vm3, %v2641_v3, %v2041_v57  ;;  %v1252_v0 = vsel %vm1230_vm3, %v2642_v28, %v2037_v1  ;;  %v1251_v56 = vsel %vm1230_vm3, %v2643_v31, %v2036_v59  ;;  %v2117_v62 = vunpack.i.h.bf16 %v4260_v34 }
 0x118   : > { %v1480_v49 = vsel %vm1461_vm10, %v1447_v9, %v2326_v23  ;;  %v1481_v58 = vsel %vm1461_vm10, %v1448_v55, %v2327_v15  ;;  %v2116_v48 = vunpack.i.l.bf16 %v4260_v34  ;;  %v1271_v47 = vsel %vm1263_vm4, %v1238_v7, %v2082_v54 }
 0x119   : > { %v1503_v11 = vpack.c.bf16 %v1481_v58, %v1480_v49  ;;  %v3809_v38 = vpop.permute.xlu0 %2334  ;;  %v1270_v29 = vsel %vm1263_vm4, %v1237_v14, %v2081_v46  ;;  %v2162_v33 = vunpack.i.h.bf16 %v3382_v61  ;;  %v1287_v39 = vsel %vm1263_vm4, %v1254_v52, %v2122_v16 }
 0x11a   : > { %v1286_v15 = vsel %vm1263_vm4, %v1253_v27, %v2121_v12  ;;  %v2197_v23 = vunpack.i.h.bf16 %v3473_v22  ;;  %v2196_v9 = vunpack.i.l.bf16 %v3473_v22  ;;  %v2202_v6 = vunpack.i.h.bf16 %v3465_v32 }
 0x11b   : > { %1943 = vmatmul.mubr.msk.bf16.vlgmr.msra.gmra.mrb[0].mxu1 %vm1537_vm11, %v1503_v11  ;;  %v3812_v20 = vpop.permute.xlu1 %2349  ;;  %v2201_v49 = vunpack.i.l.bf16 %v3465_v32  ;;  %v2332_v58 = vunpack.i.h.bf16 %v3782_v44  ;;  %v2331_v11 = vunpack.i.l.bf16 %v3782_v44  ;;  %v1284_v2 = vsel %vm1263_vm4, %v1251_v56, %v2116_v48 }
 0x11c   : > { %v1285_v61 = vsel %vm1263_vm4, %v1252_v0, %v2117_v62  ;;  %v2342_v13 = vunpack.i.h.bf16 %v3805_v4  ;;  %v2341_v19 = vunpack.i.l.bf16 %v3805_v4  ;;  %v1303_v22 = vsel %vm1296_vm5, %v1270_v29, %v2161_v43 }
 0x11d   : > { %v3814_v10 = vpop.permute.xlu0 %2344  ;;  %v1304_v18 = vsel %vm1296_vm5, %v1271_v47, %v2162_v33  ;;  %v2337_v57 = vunpack.i.h.bf16 %v3809_v38  ;;  %v2336_v32 = vunpack.i.l.bf16 %v3809_v38  ;;  %v1317_v53 = vsel %vm1296_vm5, %v1284_v2, %v2196_v9 }
 0x11e   : > { %v1318_v44 = vsel %vm1296_vm5, %v1285_v61, %v2197_v23  ;;  %v2352_v1 = vunpack.i.h.bf16 %v3812_v20  ;;  %v2351_v59 = vunpack.i.l.bf16 %v3812_v20  ;;  %v1319_v4 = vsel %vm1296_vm5, %v1286_v15, %v2201_v49 }
 0x11f   : > { %v3822_v40 = vpop.permute.xlu1 %2359  ;;  %v1320_v54 = vsel %vm1296_vm5, %v1287_v39, %v2202_v6  ;;  %v1350_v46 = vsel %vm1329_vm6, %v1317_v53, %v2331_v11  ;;  %v1351_v37 = vsel %vm1329_vm6, %v1318_v44, %v2332_v58  ;;  %v1352_v38 = vsel %vm1329_vm6, %v1319_v4, %v2341_v19 }
 0x120   : > { %v1353_v16 = vsel %vm1329_vm6, %v1320_v54, %v2342_v13  ;;  %v2347_v12 = vunpack.i.h.bf16 %v3814_v10  ;;  %v2346_v42 = vunpack.i.l.bf16 %v3814_v10  ;;  %v1337_v20 = vsel %vm1329_vm6, %v1304_v18, %v2337_v57 }
 0x121   : > { %v3828_v26 = vpop.permute.xlu0 %2354  ;;  %v1336_v50 = vsel %vm1329_vm6, %v1303_v22, %v2336_v32  ;;  %v2362_v14 = vunpack.i.h.bf16 %v3822_v40  ;;  %v2361_v30 = vunpack.i.l.bf16 %v3822_v40  ;;  %v1383_v52 = vsel %vm1362_vm7, %v1350_v46, %v2351_v59 }
 0x122   : > { %v1384_v3 = vsel %vm1362_vm7, %v1351_v37, %v2352_v1  ;;  %v2357_v27 = vunpack.i.h.bf16 %v3828_v26  ;;  %v2356_v28 = vunpack.i.l.bf16 %v3828_v26  ;;  %v1367_v62 = vsel %vm1362_vm7, %v3583_v5, %v2346_v42 }
 0x123   : > { %v3844_v36 = vpop.permute.xlu1 %2369  ;;  %v1368_v40 = vsel %vm1362_vm7, %v3586_v45, %v2347_v12  ;;  %v1385_v33 = vsel %vm1362_vm7, %v1352_v38, %v2361_v30  ;;  %v1386_v26 = vsel %vm1362_vm7, %v1353_v16, %v2362_v14 }
 0x124   : > { %v2372_v10 = vunpack.i.h.bf16 %v3844_v36  ;;  %v2371_v31 = vunpack.i.l.bf16 %v3844_v36  ;;  %v1369_v36 = vsel %vm1362_vm7, %v1336_v50, %v2356_v28  ;;  %v1370_v15 = vsel %vm1362_vm7, %v1337_v20, %v2357_v27 }
 0x125   : > { %v2365_v55 = vpop.permute.xlu0 %2364 }
 0x126   : > { %v2367_v56 = vunpack.i.h.bf16 %v2365_v55  ;;  %v2366_v34 = vunpack.i.l.bf16 %v2365_v55  ;;  %v1416_v55 = vsel %vm1395_vm8, %v1383_v52, %v2371_v31  ;;  %v1417_v45 = vsel %vm1395_vm8, %v1384_v3, %v2372_v10 }
 0x127   : > { %v2380_v35 = vpop.permute.xlu1 %2379 }
 0x128   : > { %v2382_v48 = vunpack.i.h.bf16 %v2380_v35  ;;  %v2381_v47 = vunpack.i.l.bf16 %v2380_v35  ;;  %v1400_v6 = vsel %vm1395_vm8, %v1367_v62, %v2366_v34  ;;  %v1401_v49 = vsel %vm1395_vm8, %v1368_v40, %v2367_v56 }
 0x129   : > { %v3870_v8 = vpop.permute.xlu0 %2374 }
 0x12a   : > { %v2376_v43 = vunpack.i.l.bf16 %v3870_v8  ;;  %v1418_v58 = vsel %vm1395_vm8, %v1385_v33, %v2381_v47  ;;  %v1419_v11 = vsel %vm1395_vm8, %v1386_v26, %v2382_v48  ;;  %v2377_v2 = vunpack.i.h.bf16 %v3870_v8 }
 0x12b   : > { %v2390_v7 = vpop.permute.xlu1 %2389 }
 0x12c   : > { %v2391_v39 = vunpack.i.l.bf16 %v2390_v7  ;;  %v2392_v23 = vunpack.i.h.bf16 %v2390_v7  ;;  %v1402_v19 = vsel %vm1395_vm8, %v1369_v36, %v2376_v43  ;;  %v1403_v14 = vsel %vm1395_vm8, %v1370_v15, %v2377_v2 }
 0x12d   : > { %v2385_v0 = vpop.permute.xlu0 %2384 }
 0x12e   : > { %v2386_v9 = vunpack.i.l.bf16 %v2385_v0  ;;  %v2387_v61 = vunpack.i.h.bf16 %v2385_v0  ;;  %v1449_v35 = vsel %vm1428_vm9, %v1416_v55, %v2391_v39  ;;  %v1450_v57 = vsel %vm1428_vm9, %v1417_v45, %v2392_v23 }
 0x12f   : > { %v2400_v29 = vpop.permute.xlu1 %2399 }
 0x130   : > { %v1433_v32 = vsel %vm1428_vm9, %v1400_v6, %v2386_v9  ;;  %v2402_v53 = vunpack.i.h.bf16 %v2400_v29  ;;  %v2401_v44 = vunpack.i.l.bf16 %v2400_v29  ;;  %v1434_v46 = vsel %vm1428_vm9, %v1401_v49, %v2387_v61 }
 0x131   : > { %v2395_v5 = vpop.permute.xlu0 %2394 }
 0x132   : > { %v2397_v37 = vunpack.i.h.bf16 %v2395_v5  ;;  %v2396_v38 = vunpack.i.l.bf16 %v2395_v5  ;;  %v1451_v30 = vsel %vm1428_vm9, %v1418_v58, %v2401_v44  ;;  %v1452_v52 = vsel %vm1428_vm9, %v1419_v11, %v2402_v53 }
 0x133   : > { %v2410_v13 = vpop.permute.xlu1 %2409 }
 0x134   : > { %v2412_v22 = vunpack.i.h.bf16 %v2410_v13  ;;  %v2411_v18 = vunpack.i.l.bf16 %v2410_v13  ;;  %v1435_v56 = vsel %vm1428_vm9, %v1402_v19, %v2396_v38  ;;  %v1436_v34 = vsel %vm1428_vm9, %v1403_v14, %v2397_v37 }
 0x135   : > { %v2405_v1 = vpop.permute.xlu0 %2404 }
 0x136   : > { %v1482_v59 = vsel %vm1461_vm10, %v1449_v35, %v2411_v18  ;;  %v1483_v4 = vsel %vm1461_vm10, %v1450_v57, %v2412_v22  ;;  %v2407_v8 = vunpack.i.h.bf16 %v2405_v1  ;;  %v2406_v54 = vunpack.i.l.bf16 %v2405_v1 }
 0x137   : > { %v1504_v16 = vpack.c.bf16 %v1483_v4, %v1482_v59  ;;  %v2420_v12 = vpop.permute.xlu1 %2419 }
 0x138   : > { %v1466_v42 = vsel %vm1461_vm10, %v1433_v32, %v2406_v54  ;;  %v1467_v7 = vsel %vm1461_vm10, %v1434_v46, %v2407_v8  ;;  %v2422_v20 = vunpack.i.h.bf16 %v2420_v12  ;;  %v2421_v50 = vunpack.i.l.bf16 %v2420_v12 }
 0x139   : > { %v1496_v3 = vpack.c.bf16 %v1467_v7, %v1466_v42  ;;  %v2415_v27 = vpop.permute.xlu0 %2414  ;;  %1946 = vmatprep.mubr.msk.bf16.mxu1 %vm1537_vm11, %v1504_v16 }
 0x13a   : > { %v1484_v28 = vsel %vm1461_vm10, %v1451_v30, %v2421_v50  ;;  %v1485_v0 = vsel %vm1461_vm10, %v1452_v52, %v2422_v20  ;;  %v2417_v10 = vunpack.i.h.bf16 %v2415_v27  ;;  %v2416_v31 = vunpack.i.l.bf16 %v2415_v27 }
 0x13b   : > { %v1505_v62 = vpack.c.bf16 %v1485_v0, %v1484_v28  ;;  %1930 = vmatprep.mubr.msk.bf16.mxu0 %vm1537_vm11, %v1496_v3  ;;  %v2430_v40 = vpop.permute.xlu1 %2429 }
 0x13c   : > { %v1468_v48 = vsel %vm1461_vm10, %v1435_v56, %v2416_v31  ;;  %v1469_v47 = vsel %vm1461_vm10, %v1436_v34, %v2417_v10  ;;  %v2432_v55 = vunpack.i.h.bf16 %v2430_v40  ;;  %v2431_v45 = vunpack.i.l.bf16 %v2430_v40 }
 0x13d   : > { %v1497_v29 = vpack.c.bf16 %v1469_v47, %v1468_v48  ;;  %v2425_v33 = vpop.permute.xlu0 %2424  ;;  %1947 = vmatmul.mubr.msk.bf16.gmra.mrb[4].mxu1 %vm1537_vm11, %v1505_v62 }
 0x13e   : > { %v2427_v6 = vunpack.i.h.bf16 %v2425_v33  ;;  %v2426_v49 = vunpack.i.l.bf16 %v2425_v33  ;;  %v1354_v18 = vsel %vm1329_vm6, %v3504_v41, %v2431_v45  ;;  %v1355_v57 = vsel %vm1329_vm6, %v3507_v25, %v2432_v55 }
 0x13f   : > { %1931 = vmatmul.mubr.msk.bf16.gmra.mrb[4].mxu0 %vm1537_vm11, %v1497_v29  ;;  %v2440_v26 = vpop.permute.xlu1 %2439 }
 0x140   : > { %v2442_v58 = vunpack.i.h.bf16 %v2440_v26  ;;  %v2441_v11 = vunpack.i.l.bf16 %v2440_v26  ;;  %v1338_v32 = vsel %vm1329_vm6, %v3427_v17, %v2426_v49  ;;  %v1339_v53 = vsel %vm1329_vm6, %v3430_v24, %v2427_v6 }
 0x141   : > { %v2435_v43 = vpop.permute.xlu0 %2434 }
 0x142   : > { %v2437_v61 = vunpack.i.h.bf16 %v2435_v43  ;;  %v2436_v13 = vunpack.i.l.bf16 %v2435_v43  ;;  %v1356_v44 = vsel %vm1329_vm6, %v3494_v63, %v2441_v11  ;;  %v1357_v1 = vsel %vm1329_vm6, %v3497_v60, %v2442_v58 }
 0x143   : > { %v2450_v39 = vpop.permute.xlu1 %2449 }
 0x144   : > { %v2452_v19 = vunpack.i.h.bf16 %v2450_v39  ;;  %v2451_v35 = vunpack.i.l.bf16 %v2450_v39  ;;  %v1341_v41 = vsel %vm1329_vm6, %v3418_v21, %v2437_v61  ;;  %v1340_v25 = vsel %vm1329_vm6, %v3415_v51, %v2436_v13 }
 0x145   : > { %v2445_v36 = vpop.permute.xlu0 %2444 }
 0x146   : > { %v2447_v59 = vunpack.i.h.bf16 %v2445_v36  ;;  %v2446_v4 = vunpack.i.l.bf16 %v2445_v36  ;;  %v1387_v46 = vsel %vm1362_vm7, %v1354_v18, %v2451_v35  ;;  %v1388_v24 = vsel %vm1362_vm7, %v1355_v57, %v2452_v19 }
 0x147   : > { %v2460_v15 = vpop.permute.xlu1 %2459 }
 0x148   : > { %v2462_v54 = vunpack.i.h.bf16 %v2460_v15  ;;  %v2461_v17 = vunpack.i.l.bf16 %v2460_v15  ;;  %v1371_v7 = vsel %vm1362_vm7, %v1338_v32, %v2446_v4  ;;  %v1372_v21 = vsel %vm1362_vm7, %v1339_v53, %v2447_v59 }
 0x149   : > { %v2455_v23 = vpop.permute.xlu0 %2454 }
 0x14a   : > { %v2457_v37 = vunpack.i.h.bf16 %v2455_v23  ;;  %v2456_v63 = vunpack.i.l.bf16 %v2455_v23  ;;  %v1389_v14 = vsel %vm1362_vm7, %v1356_v44, %v2461_v17  ;;  %v1390_v30 = vsel %vm1362_vm7, %v1357_v1, %v2462_v54 }
 0x14b   : > { %v2470_v9 = vpop.permute.xlu1 %2469 }
 0x14c   : > { %v2472_v16 = vunpack.i.h.bf16 %v2470_v9  ;;  %v2471_v60 = vunpack.i.l.bf16 %v2470_v9  ;;  %v1373_v27 = vsel %vm1362_vm7, %v1340_v25, %v2456_v63  ;;  %v1374_v28 = vsel %vm1362_vm7, %v1341_v41, %v2457_v37 }
 0x14d   : > { %v2465_v5 = vpop.permute.xlu0 %2464 }
 0x14e   : > { %v2467_v12 = vunpack.i.h.bf16 %v2465_v5  ;;  %v2466_v42 = vunpack.i.l.bf16 %v2465_v5  ;;  %v1420_v56 = vsel %vm1395_vm8, %v1387_v46, %v2471_v60  ;;  %v1421_v34 = vsel %vm1395_vm8, %v1388_v24, %v2472_v16 }
 0x14f   : > { %v2480_v2 = vpop.permute.xlu1 %2479 }
 0x150   : > { %v2482_v20 = vunpack.i.h.bf16 %v2480_v2  ;;  %v2481_v50 = vunpack.i.l.bf16 %v2480_v2  ;;  %v1404_v62 = vsel %vm1395_vm8, %v1371_v7, %v2466_v42  ;;  %v1405_v40 = vsel %vm1395_vm8, %v1372_v21, %v2467_v12 }
 0x151   : > { %v3928_v22 = vpop.permute.xlu0 %2474 }
 0x152   : > { %v2476_v52 = vunpack.i.l.bf16 %v3928_v22  ;;  %v1422_v48 = vsel %vm1395_vm8, %v1389_v14, %v2481_v50  ;;  %v1423_v47 = vsel %vm1395_vm8, %v1390_v30, %v2482_v20  ;;  %v2477_v29 = vunpack.i.h.bf16 %v3928_v22 }
 0x153   : > { %v2490_v8 = vpop.permute.xlu1 %2489 }
 0x154   : > { %v2491_v3 = vunpack.i.l.bf16 %v2490_v8  ;;  %v2492_v0 = vunpack.i.h.bf16 %v2490_v8  ;;  %v1406_v43 = vsel %vm1395_vm8, %v1373_v27, %v2476_v52  ;;  %v1407_v53 = vsel %vm1395_vm8, %v1374_v28, %v2477_v29  ;;  %v4262_v29 = vld [vmem:[#allocation22_spill] sm:$0xff] }
 0x155   : > { %v2485_v38 = vpop.permute.xlu0 %2484 }
 0x156   : > { %v2486_v10 = vunpack.i.l.bf16 %v2485_v38  ;;  %v2487_v33 = vunpack.i.h.bf16 %v2485_v38  ;;  %v1453_v39 = vsel %vm1428_vm9, %v1420_v56, %v2491_v3  ;;  %v1454_v23 = vsel %vm1428_vm9, %v1421_v34, %v2492_v0 }
 0x157   : > { %v2500_v51 = vpop.permute.xlu1 %2499 }
 0x158   : > { %v1437_v9 = vsel %vm1428_vm9, %v1404_v62, %v2486_v10  ;;  %v2502_v5 = vunpack.i.h.bf16 %v2500_v51  ;;  %v2501_v55 = vunpack.i.l.bf16 %v2500_v51  ;;  %v1438_v2 = vsel %vm1428_vm9, %v1405_v40, %v2487_v33 }
 0x159   : > { %v2495_v31 = vpop.permute.xlu0 %2494 }
 0x15a   : > { %v2497_v61 = vunpack.i.h.bf16 %v2495_v31  ;;  %v2496_v13 = vunpack.i.l.bf16 %v2495_v31  ;;  %v1455_v44 = vsel %vm1428_vm9, %v1422_v48, %v2501_v55  ;;  %v1456_v1 = vsel %vm1428_vm9, %v1423_v47, %v2502_v5  ;;  %v4261_v48 = vld [vmem:[#allocation21_spill] sm:$0xff] }
 0x15b   : > { %v2510_v26 = vpop.permute.xlu1 %2509 }
 0x15c   : > { %v2512_v36 = vunpack.i.h.bf16 %v2510_v26  ;;  %v2511_v15 = vunpack.i.l.bf16 %v2510_v26  ;;  %v1439_v17 = vsel %vm1428_vm9, %v1406_v43, %v2496_v13  ;;  %v1440_v46 = vsel %vm1428_vm9, %v1407_v53, %v2497_v61  ;;  %v4263_v26 = vld [vmem:[#allocation19_spill] sm:$0xff] }
 0x15d   : > { %v2505_v45 = vpop.permute.xlu0 %2504 }
 0x15e   : > { %v1486_v6 = vsel %vm1461_vm10, %v1453_v39, %v2511_v15  ;;  %v1487_v49 = vsel %vm1461_vm10, %v1454_v23, %v2512_v36  ;;  %v2507_v58 = vunpack.i.h.bf16 %v2505_v45  ;;  %v2506_v11 = vunpack.i.l.bf16 %v2505_v45  ;;  %v4264_v39 = vld [vmem:[#allocation20_spill] sm:$0xff] }
 0x15f   : > { %v1506_v19 = vpack.c.bf16 %v1487_v49, %v1486_v6  ;;  %v2520_v35 = vpop.permute.xlu1 %2519  ;;  %v4265_v15 = vld [vmem:[#allocation16_spill] sm:$0xff] }
 0x160   : > { %v1470_v22 = vsel %vm1461_vm10, %v1437_v9, %v2506_v11  ;;  %v1471_v18 = vsel %vm1461_vm10, %v1438_v2, %v2507_v58  ;;  %v2522_v57 = vunpack.i.h.bf16 %v2520_v35  ;;  %v2521_v32 = vunpack.i.l.bf16 %v2520_v35  ;;  %v4266_v9 = vld [vmem:[#allocation7_spill] sm:$0xff]  ;;  %v4267_v49 = vld [vmem:[#allocation8_spill] sm:$0xff]  ;;  %v4268_v11 = vld [vmem:[#allocation5_spill] sm:$0xff] }
 0x161   : > { %v1498_v59 = vpack.c.bf16 %v1471_v18, %v1470_v22  ;;  %v2515_v4 = vpop.permute.xlu0 %2514  ;;  %1950 = vmatprep.mubr.msk.bf16.mxu1 %vm1537_vm11, %v1506_v19 }
 0x162   : > { %v1488_v8 = vsel %vm1461_vm10, %v1455_v44, %v2521_v32  ;;  %v1489_v41 = vsel %vm1461_vm10, %v1456_v1, %v2522_v57  ;;  %v2517_v25 = vunpack.i.h.bf16 %v2515_v4  ;;  %v2516_v54 = vunpack.i.l.bf16 %v2515_v4 }
 0x163   : > { %v1507_v24 = vpack.c.bf16 %v1489_v41, %v1488_v8  ;;  %1934 = vmatprep.mubr.msk.bf16.mxu0 %vm1537_vm11, %v1498_v59  ;;  %v2530_v37 = vpop.permute.xlu1 %2529 }
 0x164   : > { %v1472_v63 = vsel %vm1461_vm10, %v1439_v17, %v2516_v54  ;;  %v1473_v38 = vsel %vm1461_vm10, %v1440_v46, %v2517_v25  ;;  %v2532_v30 = vunpack.i.h.bf16 %v2530_v37  ;;  %v2531_v52 = vunpack.i.l.bf16 %v2530_v37 }
 0x165   : > { %v1499_v16 = vpack.c.bf16 %v1473_v38, %v1472_v63  ;;  %v2525_v60 = vpop.permute.xlu0 %2524  ;;  %1951 = vmatmul.mubr.msk.bf16.gmra.mrb[8].mxu1 %vm1537_vm11, %v1507_v24 }
 0x166   : > { %v2527_v3 = vunpack.i.h.bf16 %v2525_v60  ;;  %v2526_v27 = vunpack.i.l.bf16 %v2525_v60  ;;  %v1358_v47 = vsel %vm1329_vm6, %v4261_v48, %v2531_v52  ;;  %v1359_v33 = vsel %vm1329_vm6, %v4262_v29, %v2532_v30 }
 0x167   : > { %1935 = vmatmul.mubr.msk.bf16.gmra.mrb[8].mxu0 %vm1537_vm11, %v1499_v16  ;;  %v2540_v12 = vpop.permute.xlu1 %2539 }
 0x168   : > { %v2542_v28 = vunpack.i.h.bf16 %v2540_v12  ;;  %v2541_v0 = vunpack.i.l.bf16 %v2540_v12  ;;  %v1342_v43 = vsel %vm1329_vm6, %v4263_v26, %v2526_v27  ;;  %v1343_v36 = vsel %vm1329_vm6, %v4264_v39, %v2527_v3 }
 0x169   : > { %v2535_v42 = vpop.permute.xlu0 %2534 }
 0x16a   : > { %v2537_v31 = vunpack.i.h.bf16 %v2535_v42  ;;  %v2536_v56 = vunpack.i.l.bf16 %v2535_v42  ;;  %v1360_v23 = vsel %vm1329_vm6, %v4265_v15, %v2541_v0  ;;  %v1361_v5 = vsel %vm1329_vm6, %v4266_v9, %v2542_v28 }
 0x16b   : > { %v2550_v7 = vpop.permute.xlu1 %2549 }
 0x16c   : > { %v2552_v34 = vunpack.i.h.bf16 %v2550_v7  ;;  %v2551_v62 = vunpack.i.l.bf16 %v2550_v7  ;;  %v1345_v58 = vsel %vm1329_vm6, %v4267_v49, %v2537_v31  ;;  %v1344_v2 = vsel %vm1329_vm6, %v4268_v11, %v2536_v56 }
 0x16d   : > { %v2545_v21 = vpop.permute.xlu0 %2544 }
 0x16e   : > { %v2547_v55 = vunpack.i.h.bf16 %v2545_v21  ;;  %v2546_v45 = vunpack.i.l.bf16 %v2545_v21  ;;  %v1391_v19 = vsel %vm1362_vm7, %v1358_v47, %v2551_v62  ;;  %v1392_v35 = vsel %vm1362_vm7, %v1359_v33, %v2552_v34 }
 0x16f   : > { %v2560_v20 = vpop.permute.xlu1 %2559 }
 0x170   : > { %v2562_v61 = vunpack.i.h.bf16 %v2560_v20  ;;  %v2561_v13 = vunpack.i.l.bf16 %v2560_v20  ;;  %v1375_v59 = vsel %vm1362_vm7, %v1342_v43, %v2546_v45  ;;  %v1376_v4 = vsel %vm1362_vm7, %v1343_v36, %v2547_v55 }
 0x171   : > { %v2555_v50 = vpop.permute.xlu0 %2554 }
 0x172   : > { %v2557_v22 = vunpack.i.h.bf16 %v2555_v50  ;;  %v2556_v18 = vunpack.i.l.bf16 %v2555_v50  ;;  %v1393_v54 = vsel %vm1362_vm7, %v1360_v23, %v2561_v13  ;;  %v1394_v17 = vsel %vm1362_vm7, %v1361_v5, %v2562_v61 }
 0x173   : > { %v2570_v51 = vpop.permute.xlu1 %2569 }
 0x174   : > { %v2572_v32 = vunpack.i.h.bf16 %v2570_v51  ;;  %v2571_v53 = vunpack.i.l.bf16 %v2570_v51  ;;  %v1377_v37 = vsel %vm1362_vm7, %v1344_v2, %v2556_v18  ;;  %v1378_v63 = vsel %vm1362_vm7, %v1345_v58, %v2557_v22 }
 0x175   : > { %v2565_v14 = vpop.permute.xlu0 %2564 }
 0x176   : > { %v2567_v44 = vunpack.i.h.bf16 %v2565_v14  ;;  %v2566_v1 = vunpack.i.l.bf16 %v2565_v14  ;;  %v1424_v12 = vsel %vm1395_vm8, %v1391_v19, %v2571_v53  ;;  %v1425_v42 = vsel %vm1395_vm8, %v1392_v35, %v2572_v32  ;;  %v4043_v32 = vld [vmem:[%s4152_s2] ss:$0 sm:$0xff] }
 0x177   : > { %v2580_v10 = vpop.permute.xlu1 %2579 }
 0x178   : > { %v2582_v8 = vunpack.i.h.bf16 %v2580_v10  ;;  %v2581_v41 = vunpack.i.l.bf16 %v2580_v10  ;;  %v1408_v7 = vsel %vm1395_vm8, %v1375_v59, %v2566_v1  ;;  %v1409_v21 = vsel %vm1395_vm8, %v1376_v4, %v2567_v44 }
 0x179   : > { %v3984_v40 = vpop.permute.xlu0 %2574 }
 0x17a   : > { %v2576_v46 = vunpack.i.l.bf16 %v3984_v40  ;;  %v1426_v20 = vsel %vm1395_vm8, %v1393_v54, %v2581_v41  ;;  %v1427_v50 = vsel %vm1395_vm8, %v1394_v17, %v2582_v8  ;;  %v2577_v51 = vunpack.i.h.bf16 %v3984_v40 }
 0x17b   : > { %v2590_v6 = vpop.permute.xlu1 %2589 }
 0x17c   : > { %v2591_v24 = vunpack.i.l.bf16 %v2590_v6  ;;  %v2592_v38 = vunpack.i.h.bf16 %v2590_v6  ;;  %v1410_v52 = vsel %vm1395_vm8, %v1377_v37, %v2576_v46  ;;  %v1411_v5 = vsel %vm1395_vm8, %v1378_v63, %v2577_v51 }
 0x17d   : > { %v2585_v57 = vpop.permute.xlu0 %2584 }
 0x17e   : > { %v2586_v16 = vunpack.i.l.bf16 %v2585_v57  ;;  %v2587_v14 = vunpack.i.h.bf16 %v2585_v57  ;;  %v1457_v3 = vsel %vm1428_vm9, %v1424_v12, %v2591_v24  ;;  %v1458_v0 = vsel %vm1428_vm9, %v1425_v42, %v2592_v38 }
 0x17f   : > { %v2600_v25 = vpop.permute.xlu1 %2599 }
 0x180   : > { %v1441_v10 = vsel %vm1428_vm9, %v1408_v7, %v2586_v16  ;;  %v2602_v31 = vunpack.i.h.bf16 %v2600_v25  ;;  %v2601_v56 = vunpack.i.l.bf16 %v2600_v25  ;;  %v1442_v29 = vsel %vm1428_vm9, %v1409_v21, %v2587_v14 }
 0x181   : > { %v2595_v60 = vpop.permute.xlu0 %2594 }
 0x182   : > { %v2597_v33 = vunpack.i.h.bf16 %v2595_v60  ;;  %v2596_v26 = vunpack.i.l.bf16 %v2595_v60  ;;  %v1459_v55 = vsel %vm1428_vm9, %v1426_v20, %v2601_v56  ;;  %v1460_v45 = vsel %vm1428_vm9, %v1427_v50, %v2602_v31 }
 0x183   : > { %v2610_v30 = vpop.permute.xlu1 %2609 }
 0x184   : > { %v2612_v27 = vunpack.i.h.bf16 %v2610_v30  ;;  %v2611_v28 = vunpack.i.l.bf16 %v2610_v30  ;;  %v1443_v13 = vsel %vm1428_vm9, %v1410_v52, %v2596_v26  ;;  %v1444_v19 = vsel %vm1428_vm9, %v1411_v5, %v2597_v33 }
 0x185   : > { %v2605_v34 = vpop.permute.xlu0 %2604 }
 0x186   : > { %v1490_v62 = vsel %vm1461_vm10, %v1457_v3, %v2611_v28  ;;  %v1491_v48 = vsel %vm1461_vm10, %v1458_v0, %v2612_v27  ;;  %v2607_v40 = vunpack.i.h.bf16 %v2605_v34  ;;  %v2606_v47 = vunpack.i.l.bf16 %v2605_v34 }
 0x187   : > { %v1508_v43 = vpack.c.bf16 %v1491_v48, %v1490_v62  ;;  %v2620_v39 = vpop.permute.xlu1 %2619 }
 0x188   : > { %v1474_v36 = vsel %vm1461_vm10, %v1441_v10, %v2606_v47  ;;  %v1475_v15 = vsel %vm1461_vm10, %v1442_v29, %v2607_v40  ;;  %v2622_v23 = vunpack.i.h.bf16 %v2620_v39  ;;  %v2621_v9 = vunpack.i.l.bf16 %v2620_v39 }
 0x189   : > { %v1500_v6 = vpack.c.bf16 %v1475_v15, %v1474_v36  ;;  %v2615_v49 = vpop.permute.xlu0 %2614  ;;  %1954 = vmatprep.mubr.msk.bf16.mxu1 %vm1537_vm11, %v1508_v43 }
 0x18a   : > { %v1492_v58 = vsel %vm1461_vm10, %v1459_v55, %v2621_v9  ;;  %v1493_v11 = vsel %vm1461_vm10, %v1460_v45, %v2622_v23  ;;  %v2617_v2 = vunpack.i.h.bf16 %v2615_v49  ;;  %v2616_v61 = vunpack.i.l.bf16 %v2615_v49 }
 0x18b   : > { %v1509_v35 = vpack.c.bf16 %v1493_v11, %v1492_v58  ;;  %1938 = vmatprep.mubr.msk.bf16.mxu0 %vm1537_vm11, %v1500_v6 }
 0x18c   : > { %v1476_v22 = vsel %vm1461_vm10, %v1443_v13, %v2616_v61  ;;  %v1477_v18 = vsel %vm1461_vm10, %v1444_v19, %v2617_v2 }
 0x18d   : > { %v1501_v57 = vpack.c.bf16 %v1477_v18, %v1476_v22  ;;  %1955 = vmatmul.mubr.msk.bf16.gmra.mrb[12].mxu1 %vm1537_vm11, %v1509_v35 }
 0x18f   : > { %1939 = vmatmul.mubr.msk.bf16.gmra.mrb[12].mxu0 %vm1537_vm11, %v1501_v57 }
 0x1e8   : > { %v1928_v53 = vpop.f32.mrb[0].mxu0 }
 0x1e9   : > { %v1633_v44 = vadd.f32 %v1928_v53, %v4043_v32  ;;  %v1624_v1 = vpop.f32.mrb[1].mxu0 }
 0x1ea   : > { %v1625_v59 = vadd.f32 %v4043_v32, %v1624_v1  ;;  %v1929_v4 = vpop.f32.mrb[2].mxu0 }
 0x1eb   : > { %v1753_v8 = vmax.f32 %v1633_v44, 0.0  ;;  %v1636_v41 = vadd.f32 %v1929_v4, %v4043_v32  ;;  %v1627_v25 = vpop.f32.mrb[3].mxu0 }
 0x1ec   : > { %v1751_v54 = vmax.f32 %v1625_v59, 0.0  ;;  %v1628_v17 = vadd.f32 %v4043_v32, %v1627_v25 }
 0x1ed   : > { %1785 = vst.msk [vmem:[%s4050_s10 + $0x10] sm:$0xff] %vm1263_vm4, %v1753_v8  ;;  %v1754_v46 = vmax.f32 %v1636_v41, 0.0 }
 0x1ee   : > { %1783 = vst.msk [vmem:[%s4050_s10] sm:$0xff] %vm1263_vm4, %v1751_v54  ;;  %v1752_v24 = vmax.f32 %v1628_v17, 0.0  ;;  %v1944_v37 = vpop.f32.mrb[0].mxu1 }
 0x1ef   : > { %1786 = vst.msk [vmem:[%s4050_s10 + $0x18] sm:$0xff] %vm1263_vm4, %v1754_v46  ;;  %v1697_v63 = vadd.f32 %v1944_v37, %v4043_v32  ;;  %v1688_v38 = vpop.f32.mrb[1].mxu1 }
 0x1f0   : > { %1784 = vst.msk [vmem:[%s4050_s10 + $0x8] sm:$0xff] %vm1263_vm4, %v1752_v24  ;;  %v1689_v16 = vadd.f32 %v4043_v32, %v1688_v38  ;;  %v1945_v60 = vpop.f32.mrb[2].mxu1 }
 0x1f1   : > { %v1769_v12 = vmax.f32 %v1697_v63, 0.0  ;;  %v1700_v42 = vadd.f32 %v1945_v60, %v4043_v32  ;;  %v1691_v7 = vpop.f32.mrb[3].mxu1 }
 0x1f2   : > { %v1767_v21 = vmax.f32 %v1689_v16, 0.0  ;;  %v1692_v20 = vadd.f32 %v4043_v32, %v1691_v7 }
 0x1f3   : > { %1801 = vst.msk [vmem:[%s4050_s10 + $0x90] sm:$0xff] %vm1263_vm4, %v1769_v12  ;;  %v1770_v50 = vmax.f32 %v1700_v42, 0.0 }
 0x1f4   : > { %1799 = vst.msk [vmem:[%s4050_s10 + $0x80] sm:$0xff] %vm1263_vm4, %v1767_v21  ;;  %v1768_v51 = vmax.f32 %v1692_v20, 0.0 }
 0x1f5   : > { %1802 = vst.msk [vmem:[%s4050_s10 + $0x98] sm:$0xff] %vm1263_vm4, %v1770_v50 }
 0x1f6   : > { %1800 = vst.msk [vmem:[%s4050_s10 + $0x88] sm:$0xff] %vm1263_vm4, %v1768_v51 }
 0x210   : > { %v1948_v14 = vpop.f32.mrb[4].mxu1 }
 0x211   : > { %v1713_v30 = vadd.f32 %v1948_v14, %v4043_v32  ;;  %v1704_v52 = vpop.f32.mrb[5].mxu1 }
 0x212   : > { %v1932_v3 = vpop.f32.mrb[4].mxu0  ;;  %v1705_v27 = vadd.f32 %v4043_v32, %v1704_v52  ;;  %v1949_v28 = vpop.f32.mrb[6].mxu1 }
 0x213   : > { %v1649_v0 = vadd.f32 %v1932_v3, %v4043_v32  ;;  %v1773_v10 = vmax.f32 %v1713_v30, 0.0  ;;  %v1640_v31 = vpop.f32.mrb[5].mxu0  ;;  %v1716_v56 = vadd.f32 %v1949_v28, %v4043_v32  ;;  %v1707_v34 = vpop.f32.mrb[7].mxu1 }
 0x214   : > { %v1641_v62 = vadd.f32 %v4043_v32, %v1640_v31  ;;  %v1771_v48 = vmax.f32 %v1705_v27, 0.0  ;;  %v1933_v40 = vpop.f32.mrb[6].mxu0  ;;  %v1708_v47 = vadd.f32 %v4043_v32, %v1707_v34 }
 0x215   : > { %v1757_v29 = vmax.f32 %v1649_v0, 0.0  ;;  %1805 = vst.msk [vmem:[%s4050_s10 + $0xb0] sm:$0xff] %vm1263_vm4, %v1773_v10  ;;  %v1652_v33 = vadd.f32 %v1933_v40, %v4043_v32  ;;  %v1774_v26 = vmax.f32 %v1716_v56, 0.0  ;;  %v1643_v43 = vpop.f32.mrb[7].mxu0 }
 0x216   : > { %v1755_v39 = vmax.f32 %v1641_v62, 0.0  ;;  %1803 = vst.msk [vmem:[%s4050_s10 + $0xa0] sm:$0xff] %vm1263_vm4, %v1771_v48  ;;  %v1644_v36 = vadd.f32 %v4043_v32, %v1643_v43  ;;  %v1772_v15 = vmax.f32 %v1708_v47, 0.0 }
 0x217   : > { %1789 = vst.msk [vmem:[%s4050_s10 + $0x30] sm:$0xff] %vm1263_vm4, %v1757_v29  ;;  %v1758_v23 = vmax.f32 %v1652_v33, 0.0  ;;  %1806 = vst.msk [vmem:[%s4050_s10 + $0xb8] sm:$0xff] %vm1263_vm4, %v1774_v26 }
 0x218   : > { %1787 = vst.msk [vmem:[%s4050_s10 + $0x20] sm:$0xff] %vm1263_vm4, %v1755_v39  ;;  %v1756_v9 = vmax.f32 %v1644_v36, 0.0  ;;  %1804 = vst.msk [vmem:[%s4050_s10 + $0xa8] sm:$0xff] %vm1263_vm4, %v1772_v15 }
 0x219   : > { %1790 = vst.msk [vmem:[%s4050_s10 + $0x38] sm:$0xff] %vm1263_vm4, %v1758_v23 }
 0x21a   : > { %1788 = vst.msk [vmem:[%s4050_s10 + $0x28] sm:$0xff] %vm1263_vm4, %v1756_v9 }
 0x238   : > { %v1952_v5 = vpop.f32.mrb[8].mxu1 }
 0x239   : > { %v1729_v55 = vadd.f32 %v1952_v5, %v4043_v32  ;;  %v1720_v45 = vpop.f32.mrb[9].mxu1 }
 0x23a   : > { %v1936_v6 = vpop.f32.mrb[8].mxu0  ;;  %v1721_v49 = vadd.f32 %v4043_v32, %v1720_v45  ;;  %v1953_v58 = vpop.f32.mrb[10].mxu1 }
 0x23b   : > { %v1665_v11 = vadd.f32 %v1936_v6, %v4043_v32  ;;  %v1777_v2 = vmax.f32 %v1729_v55, 0.0  ;;  %v1656_v61 = vpop.f32.mrb[9].mxu0  ;;  %v1732_v13 = vadd.f32 %v1953_v58, %v4043_v32  ;;  %v1723_v19 = vpop.f32.mrb[11].mxu1 }
 0x23c   : > { %v1657_v35 = vadd.f32 %v4043_v32, %v1656_v61  ;;  %v1775_v22 = vmax.f32 %v1721_v49, 0.0  ;;  %v1937_v18 = vpop.f32.mrb[10].mxu0  ;;  %v1724_v57 = vadd.f32 %v4043_v32, %v1723_v19 }
 0x23d   : > { %v1761_v53 = vmax.f32 %v1665_v11, 0.0  ;;  %1809 = vst.msk [vmem:[%s4050_s10 + $0xd0] sm:$0xff] %vm1263_vm4, %v1777_v2  ;;  %v1668_v44 = vadd.f32 %v1937_v18, %v4043_v32  ;;  %v1778_v1 = vmax.f32 %v1732_v13, 0.0  ;;  %v1659_v59 = vpop.f32.mrb[11].mxu0 }
 0x23e   : > { %v1759_v4 = vmax.f32 %v1657_v35, 0.0  ;;  %1807 = vst.msk [vmem:[%s4050_s10 + $0xc0] sm:$0xff] %vm1263_vm4, %v1775_v22  ;;  %v1660_v8 = vadd.f32 %v4043_v32, %v1659_v59  ;;  %v1776_v41 = vmax.f32 %v1724_v57, 0.0 }
 0x23f   : > { %1793 = vst.msk [vmem:[%s4050_s10 + $0x50] sm:$0xff] %vm1263_vm4, %v1761_v53  ;;  %v1762_v25 = vmax.f32 %v1668_v44, 0.0  ;;  %1810 = vst.msk [vmem:[%s4050_s10 + $0xd8] sm:$0xff] %vm1263_vm4, %v1778_v1 }
 0x240   : > { %1791 = vst.msk [vmem:[%s4050_s10 + $0x40] sm:$0xff] %vm1263_vm4, %v1759_v4  ;;  %v1760_v54 = vmax.f32 %v1660_v8, 0.0  ;;  %1808 = vst.msk [vmem:[%s4050_s10 + $0xc8] sm:$0xff] %vm1263_vm4, %v1776_v41 }
 0x241   : > { %1794 = vst.msk [vmem:[%s4050_s10 + $0x58] sm:$0xff] %vm1263_vm4, %v1762_v25 }
 0x242   : > { %1792 = vst.msk [vmem:[%s4050_s10 + $0x48] sm:$0xff] %vm1263_vm4, %v1760_v54 }
 0x260   : > { %v1956_v17 = vpop.f32.mrb[12].mxu1 }
 0x261   : > { %v1745_v46 = vadd.f32 %v1956_v17, %v4043_v32  ;;  %v1736_v24 = vpop.f32.mrb[13].mxu1 }
 0x262   : > { %v1940_v37 = vpop.f32.mrb[12].mxu0  ;;  %v1737_v63 = vadd.f32 %v4043_v32, %v1736_v24  ;;  %v1957_v38 = vpop.f32.mrb[14].mxu1 }
 0x263   : > { %v1681_v16 = vadd.f32 %v1940_v37, %v4043_v32  ;;  %v1781_v60 = vmax.f32 %v1745_v46, 0.0  ;;  %v1672_v12 = vpop.f32.mrb[13].mxu0  ;;  %v1748_v42 = vadd.f32 %v1957_v38, %v4043_v32  ;;  %v1739_v7 = vpop.f32.mrb[15].mxu1 }
 0x264   : > { %v1673_v21 = vadd.f32 %v4043_v32, %v1672_v12  ;;  %v1779_v20 = vmax.f32 %v1737_v63, 0.0  ;;  %v1941_v50 = vpop.f32.mrb[14].mxu0  ;;  %v1740_v51 = vadd.f32 %v4043_v32, %v1739_v7 }
 0x265   : > { %v1765_v14 = vmax.f32 %v1681_v16, 0.0  ;;  %1813 = vst.msk [vmem:[%s4050_s10 + $0xf0] sm:$0xff] %vm1263_vm4, %v1781_v60  ;;  %v1684_v30 = vadd.f32 %v1941_v50, %v4043_v32  ;;  %v1782_v52 = vmax.f32 %v1748_v42, 0.0  ;;  %v1675_v3 = vpop.f32.mrb[15].mxu0 }
 0x266   : > { %v1763_v27 = vmax.f32 %v1673_v21, 0.0  ;;  %1811 = vst.msk [vmem:[%s4050_s10 + $0xe0] sm:$0xff] %vm1263_vm4, %v1779_v20  ;;  %v1676_v28 = vadd.f32 %v4043_v32, %v1675_v3  ;;  %v1780_v0 = vmax.f32 %v1740_v51, 0.0 }
 0x267   : > { %1797 = vst.msk [vmem:[%s4050_s10 + $0x70] sm:$0xff] %vm1263_vm4, %v1765_v14  ;;  %v1766_v10 = vmax.f32 %v1684_v30, 0.0  ;;  %1814 = vst.msk [vmem:[%s4050_s10 + $0xf8] sm:$0xff] %vm1263_vm4, %v1782_v52 }
 0x268   : > { %1795 = vst.msk [vmem:[%s4050_s10 + $0x60] sm:$0xff] %vm1263_vm4, %v1763_v27  ;;  %v1764_v31 = vmax.f32 %v1676_v28, 0.0  ;;  %1812 = vst.msk [vmem:[%s4050_s10 + $0xe8] sm:$0xff] %vm1263_vm4, %v1780_v0 }
 0x269   : > { %1798 = vst.msk [vmem:[%s4050_s10 + $0x78] sm:$0xff] %vm1263_vm4, %v1766_v10 }
 0x26a   : > { %1796 = vst.msk [vmem:[%s4050_s10 + $0x68] sm:$0xff] %vm1263_vm4, %v1764_v31 }
 0x26b PF: > { %s13_s12 = sadd.s32 1, %s2650_s12  }
 0x26c   : > { %p10_p4 = scmp.ge.s32.totalorder %s13_s12, 4  }
 0x26e   :  { %12 = sbr.rel (!%p10_p4) target bundleno = 1 (0x1), region = 62 }

</bundles_post_ra>
